<compile_context>
chip_gen: v7x
topology: tpu7x:2x2x1
jax: 0.10.0
libtpu: 0.0.40
codegen_flags: <defaults>
</compile_context>

<pallas_src>
import functools

import jax
import jax.numpy as jnp
from jax import lax
from jax.experimental import pallas as pl
from jax.experimental.pallas import tpu as pltpu


# ------------------------------ fused kernel ------------------------------ #

def _decoder_layer_kernel(
    # per-batch activations
    q_ref, kv_ref,
    # self-attention: fused QKV proj, fc_o, LN1
    wqkv_ref, bqkv_ref, wo1_ref, bo1_ref, g1_ref, be1_ref,
    # cross-attention: fused KV proj (fc_q is None), fc_o, LN2
    wkv_ref, bkv_ref, wo2_ref, bo2_ref, g2_ref, be2_ref,
    # FFN + LN3
    w1_ref, b1_ref, w2_ref, b2_ref, g3_ref, be3_ref,
    # output
    o_ref,
    # VMEM scratch for the per-head attention context
    ctx_scr,
    *, head_n, head_dim, eps):
    D = head_n * head_dim
    inv_scale = 1.0 / (float(head_dim) ** 0.5)
    bf16 = jnp.bfloat16

    def matmul(x, w_ref, b_ref):
        # bf16 operands on the MXU, f32 accumulation, f32 bias add.
        return jnp.dot(x.astype(bf16), w_ref[...],
                       preferred_element_type=jnp.float32) + b_ref[...]

    def layernorm(y, g_ref, b_ref):
        # Stats in f32; two-pass form kept deliberately (more robust than
        # E[x^2] - mu^2) — it is two tiny XLU reduces per block.
        mu = jnp.mean(y, axis=-1, keepdims=True)
        var = jnp.mean(jnp.square(y - mu), axis=-1, keepdims=True)
        return (y - mu) * lax.rsqrt(var + eps) * g_ref[...] + b_ref[...]

    def mha(q_full, k_full, v_full):
        # Heads = static lane slices of the lane-dense (rows, D) activations.
        # Per-head context lands at its lane offset in the VMEM scratch so the
        # following fc_o is a single (rows, D) @ (D, D) matmul.
        for h in range(head_n):
            sl = slice(h * head_dim, (h + 1) * head_dim)
            qh = q_full[:, sl].astype(bf16)
            kh = k_full[:, sl].astype(bf16)
            vh = v_full[:, sl].astype(bf16)
            s = lax.dot_general(qh, kh, (((1,), (1,)), ((), ())),
                                preferred_element_type=jnp.float32) * inv_scale
            s = s - jnp.max(s, axis=-1, keepdims=True)          # f32 softmax
            e = jnp.exp(s)                                       # EUP
            p = e * pl.reciprocal(jnp.sum(e, axis=-1, keepdims=True),
                                  approx=True)                   # EUP rcp
            ctx_scr[:, sl] = jnp.dot(p.astype(bf16), vh,
                                     preferred_element_type=jnp.float32)
        return ctx_scr[...]

    x = q_ref[0]        # (Lq, D) query / residual stream, f32
    kv_in = kv_ref[0]   # (Lk, D) key (= value) stream, f32

    # 1) self-attention + residual + LayerNorm ----------------------------- #
    qkv = matmul(x, wqkv_ref, bqkv_ref)                         # (Lq, 3D)
    ctx = mha(qkv[:, :D], qkv[:, D:2 * D], qkv[:, 2 * D:])
    tgt = layernorm(x + matmul(ctx, wo1_ref, bo1_ref), g1_ref, be1_ref)

    # 2) cross-attention (fc_q is None -> Q = target) + residual + LN ------ #
    kv = matmul(kv_in, wkv_ref, bkv_ref)                        # (Lk, 2D)
    ctx2 = mha(tgt, kv[:, :D], kv[:, D:])
    tgt = layernorm(tgt + matmul(ctx2, wo2_ref, bo2_ref), g2_ref, be2_ref)

    # 3) FFN (fc1 -> ReLU -> fc2), hidden stays in VMEM, + residual + LN --- #
    hid = jnp.maximum(matmul(tgt, w1_ref, b1_ref), 0.0)         # (Lq, F)
    y = tgt + matmul(hid, w2_ref, b2_ref)
    o_ref[0] = layernorm(y, g3_ref, be3_ref).astype(o_ref.dtype)


# -------------------------------- wrapper ---------------------------------- #

def decoder_layer_forward(query, key, pp, *, head_n, eps=1e-5):
    """query: (B, Lq, D) f32, key: (B, Lk, D) f32, pp: packed params -> (B, Lq, D)."""
    B, Lq, D = query.shape
    _, Lk, _ = key.shape
    F = pp["w1"].shape[1]
    d = D // head_n

    kernel = functools.partial(_decoder_layer_kernel,
                               head_n=head_n, head_dim=d, eps=eps)

    def const2d(shape):   # weight/bias/LN blocks: constant block index
        return pl.BlockSpec(shape, lambda b: (0, 0))

    in_specs = [
        pl.BlockSpec((1, Lq, D), lambda b: (b, 0, 0)),          # query
        pl.BlockSpec((1, Lk, D), lambda b: (b, 0, 0)),          # key
        const2d((D, 3 * D)), const2d((1, 3 * D)),               # wqkv, bqkv
        const2d((D, D)), const2d((1, D)),                       # wo1, bo1
        const2d((1, D)), const2d((1, D)),                       # ln1 gamma, beta
        const2d((D, 2 * D)), const2d((1, 2 * D)),               # wkv, bkv
        const2d((D, D)), const2d((1, D)),                       # wo2, bo2
        const2d((1, D)), const2d((1, D)),                       # ln2 gamma, beta
        const2d((D, F)), const2d((1, F)),                       # w1, b1
        const2d((F, D)), const2d((1, D)),                       # w2, b2
        const2d((1, D)), const2d((1, D)),                       # ln3 gamma, beta
    ]

    return pl.pallas_call(
        kernel,
        out_shape=jax.ShapeDtypeStruct((B, Lq, D), query.dtype),
        grid=(B,),
        in_specs=in_specs,
        out_specs=pl.BlockSpec((1, Lq, D), lambda b: (b, 0, 0)),
        scratch_shapes=[pltpu.VMEM((Lq, D), jnp.float32)],
        compiler_params=pltpu.CompilerParams(
            dimension_semantics=("parallel",),          # batch across v7x TCs
            vmem_limit_bytes=48 * 1024 * 1024),
    )(query, key,
      pp["wqkv"], pp["bqkv"], pp["wo1"], pp["bo1"], pp["g1"], pp["be1"],
      pp["wkv"], pp["bkv"], pp["wo2"], pp["bo2"], pp["g2"], pp["be2"],
      pp["w1"], pp["b1"], pp["w2"], pp["b2"], pp["g3"], pp["be3"])


# --------------------------- parameters & packing --------------------------- #

def _dense_init(key, fan_in, fan_out):
    kw, kb = jax.random.split(key)
    bound = 1.0 / (fan_in ** 0.5)
    w = jax.random.uniform(kw, (fan_in, fan_out), jnp.float32, -bound, bound)
    b = jax.random.uniform(kb, (fan_out,), jnp.float32, -bound, bound)
    return w, b


def make_params(key, hidden_dim, head_n, feedforward_dim):
    """Torch-like parameter tree (all f32, per-projection weights)."""
    ks = jax.random.split(key, 12)

    def attn(kq, kk, kv, ko, with_q):
        p = {}
        if with_q:
            p["wq"], p["bq"] = _dense_init(kq, hidden_dim, hidden_dim)
        p["wk"], p["bk"] = _dense_init(kk, hidden_dim, hidden_dim)
        p["wv"], p["bv"] = _dense_init(kv, hidden_dim, hidden_dim)
        p["wo"], p["bo"] = _dense_init(ko, hidden_dim, hidden_dim)
        return p

    def ln(k):
        kg, kb = jax.random.split(k)
        return {"gamma": 1.0 + 0.05 * jax.random.normal(kg, (hidden_dim,), jnp.float32),
                "beta": 0.05 * jax.random.normal(kb, (hidden_dim,), jnp.float32)}

    w1, b1 = _dense_init(ks[8], hidden_dim, feedforward_dim)
    w2, b2 = _dense_init(ks[9], feedforward_dim, hidden_dim)
    return {
        "attn1": attn(ks[0], ks[1], ks[2], ks[3], True),
        "attn2": attn(None, ks[4], ks[5], ks[6], False),
        "ln1": ln(ks[7]), "ln2": ln(ks[10]), "ln3": ln(ks[11]),
        "ffn": {"w1": w1, "b1": b1, "w2": w2, "b2": b2},
    }


def pack_params(p):
    """Fuse QKV / KV weights, cast weights to bf16, reshape vectors to (1, N)."""
    bf16 = jnp.bfloat16
    a1, a2, f = p["attn1"], p["attn2"], p["ffn"]
    row = lambda v: v.reshape(1, -1)
    return {
        "wqkv": jnp.concatenate([a1["wq"], a1["wk"], a1["wv"]], axis=1).astype(bf16),
        "bqkv": row(jnp.concatenate([a1["bq"], a1["bk"], a1["bv"]])),
        "wo1": a1["wo"].astype(bf16), "bo1": row(a1["bo"]),
        "g1": row(p["ln1"]["gamma"]), "be1": row(p["ln1"]["beta"]),
        "wkv": jnp.concatenate([a2["wk"], a2["wv"]], axis=1).astype(bf16),
        "bkv": row(jnp.concatenate([a2["bk"], a2["bv"]])),
        "wo2": a2["wo"].astype(bf16), "bo2": row(a2["bo"]),
        "g2": row(p["ln2"]["gamma"]), "be2": row(p["ln2"]["beta"]),
        "w1": f["w1"].astype(bf16), "b1": row(f["b1"]),
        "w2": f["w2"].astype(bf16), "b2": row(f["b2"]),
        "g3": row(p["ln3"]["gamma"]), "be3": row(p["ln3"]["beta"]),
    }


# ---------------------------- pure-JAX reference --------------------------- #

def reference_forward(query, key, params, *, head_n, eps=1e-5):
    def mha(q_in, k_in, v_in, p, has_q):
        B, Lq, D = q_in.shape
        d = D // head_n
        Q = q_in @ p["wq"] + p["bq"] if has_q else q_in
        K = k_in @ p["wk"] + p["bk"]
        V = v_in @ p["wv"] + p["bv"]
        split = lambda x: x.reshape(x.shape[0], x.shape[1], head_n, d).transpose(0, 2, 1, 3)
        Qh, Kh, Vh = split(Q), split(K), split(V)
        s = jnp.einsum("bhqd,bhkd->bhqk", Qh, Kh) / (d ** 0.5)
        a = jax.nn.softmax(s, axis=-1)
        ctx = jnp.einsum("bhqk,bhkd->bhqd", a, Vh)
        ctx = ctx.transpose(0, 2, 1, 3).reshape(B, Lq, D)
        return ctx @ p["wo"] + p["bo"]

    def layer_norm(x, lnp):
        mu = jnp.mean(x, -1, keepdims=True)
        var = jnp.mean((x - mu) ** 2, -1, keepdims=True)
        return (x - mu) / jnp.sqrt(var + eps) * lnp["gamma"] + lnp["beta"]

    t = layer_norm(query + mha(query, query, query, params["attn1"], True), params["ln1"])
    t = layer_norm(t + mha(t, key, key, params["attn2"], False), params["ln2"])
    f = params["ffn"]
    h = jnp.maximum(t @ f["w1"] + f["b1"], 0.0)
    y = h @ f["w2"] + f["b2"]
    return layer_norm(t + y, params["ln3"])


# ---------------------------------- main ----------------------------------- #

if __name__ == "__main__":
    B = 2
    Lq, Lk = 8, 16            # query / (key, value) sequence lengths
    hidden_dim = 128          # scaled-down stand-in for 512 (lane-dense)
    head_n = 4
    feedforward_dim = 256     # scaled-down stand-in for 2048

    root = jax.random.PRNGKey(0)
    kp, kq, kk = jax.random.split(root, 3)
    params = make_params(kp, hidden_dim, head_n, feedforward_dim)
    packed = pack_params(params)
    query = jax.random.normal(kq, (B, Lq, hidden_dim), jnp.float32)
    key = jax.random.normal(kk, (B, Lk, hidden_dim), jnp.float32)

    fwd = jax.jit(functools.partial(decoder_layer_forward, head_n=head_n))
    out = fwd(query, key, packed)
    jax.block_until_ready(out)

    assert out.shape == (B, Lq, hidden_dim), out.shape
    assert bool(jnp.all(jnp.isfinite(out)))
    ref = reference_forward(query, key, params, head_n=head_n)
    err = float(jnp.max(jnp.abs(out - ref)))
    assert err < 0.35, f"max abs err vs f32 reference: {err}"
    print("KERNEL_OK")
</pallas_src>

<mosaic_0001>
module attributes {stable_mosaic.version = 11 : i64} {
  func.func @_decoder_layer_kernel(%arg0: i32, %arg1: memref<1x8x128xf32, #tpu.memory_space<vmem>>, %arg2: memref<1x16x128xf32, #tpu.memory_space<vmem>>, %arg3: memref<128x384xbf16, #tpu.memory_space<vmem>>, %arg4: memref<1x384xf32, #tpu.memory_space<vmem>>, %arg5: memref<128x128xbf16, #tpu.memory_space<vmem>>, %arg6: memref<1x128xf32, #tpu.memory_space<vmem>>, %arg7: memref<1x128xf32, #tpu.memory_space<vmem>>, %arg8: memref<1x128xf32, #tpu.memory_space<vmem>>, %arg9: memref<128x256xbf16, #tpu.memory_space<vmem>>, %arg10: memref<1x256xf32, #tpu.memory_space<vmem>>, %arg11: memref<128x128xbf16, #tpu.memory_space<vmem>>, %arg12: memref<1x128xf32, #tpu.memory_space<vmem>>, %arg13: memref<1x128xf32, #tpu.memory_space<vmem>>, %arg14: memref<1x128xf32, #tpu.memory_space<vmem>>, %arg15: memref<128x256xbf16, #tpu.memory_space<vmem>>, %arg16: memref<1x256xf32, #tpu.memory_space<vmem>>, %arg17: memref<256x128xbf16, #tpu.memory_space<vmem>>, %arg18: memref<1x128xf32, #tpu.memory_space<vmem>>, %arg19: memref<1x128xf32, #tpu.memory_space<vmem>>, %arg20: memref<1x128xf32, #tpu.memory_space<vmem>>, %arg21: memref<1x8x128xf32, #tpu.memory_space<vmem>>, %arg22: memref<8x128xf32, #tpu.memory_space<vmem>>) attributes {dimension_semantics = [#tpu.dimension_semantics<parallel>], iteration_bounds = array<i64: 2>, scalar_prefetch = 0 : i64, scratch_operands = 1 : i64, tpu.core_type = #tpu.core_type<tc>, window_params = [{transform_indices = @transform_0, window_bounds = array<i64: 1, 8, 128>}, {transform_indices = @transform_1, window_bounds = array<i64: 1, 16, 128>}, {pipeline_mode = #tpu.pipeline_mode<synchronous>, transform_indices = @transform_2, window_bounds = array<i64: 128, 384>}, {pipeline_mode = #tpu.pipeline_mode<synchronous>, transform_indices = @transform_3, window_bounds = array<i64: 1, 384>}, {pipeline_mode = #tpu.pipeline_mode<synchronous>, transform_indices = @transform_4, window_bounds = array<i64: 128, 128>}, {pipeline_mode = #tpu.pipeline_mode<synchronous>, transform_indices = @transform_5, window_bounds = array<i64: 1, 128>}, {pipeline_mode = #tpu.pipeline_mode<synchronous>, transform_indices = @transform_6, window_bounds = array<i64: 1, 128>}, {pipeline_mode = #tpu.pipeline_mode<synchronous>, transform_indices = @transform_7, window_bounds = array<i64: 1, 128>}, {pipeline_mode = #tpu.pipeline_mode<synchronous>, transform_indices = @transform_8, window_bounds = array<i64: 128, 256>}, {pipeline_mode = #tpu.pipeline_mode<synchronous>, transform_indices = @transform_9, window_bounds = array<i64: 1, 256>}, {pipeline_mode = #tpu.pipeline_mode<synchronous>, transform_indices = @transform_10, window_bounds = array<i64: 128, 128>}, {pipeline_mode = #tpu.pipeline_mode<synchronous>, transform_indices = @transform_11, window_bounds = array<i64: 1, 128>}, {pipeline_mode = #tpu.pipeline_mode<synchronous>, transform_indices = @transform_12, window_bounds = array<i64: 1, 128>}, {pipeline_mode = #tpu.pipeline_mode<synchronous>, transform_indices = @transform_13, window_bounds = array<i64: 1, 128>}, {pipeline_mode = #tpu.pipeline_mode<synchronous>, transform_indices = @transform_14, window_bounds = array<i64: 128, 256>}, {pipeline_mode = #tpu.pipeline_mode<synchronous>, transform_indices = @transform_15, window_bounds = array<i64: 1, 256>}, {pipeline_mode = #tpu.pipeline_mode<synchronous>, transform_indices = @transform_16, window_bounds = array<i64: 256, 128>}, {pipeline_mode = #tpu.pipeline_mode<synchronous>, transform_indices = @transform_17, window_bounds = array<i64: 1, 128>}, {pipeline_mode = #tpu.pipeline_mode<synchronous>, transform_indices = @transform_18, window_bounds = array<i64: 1, 128>}, {pipeline_mode = #tpu.pipeline_mode<synchronous>, transform_indices = @transform_19, window_bounds = array<i64: 1, 128>}, {transform_indices = @transform_20, window_bounds = array<i64: 1, 8, 128>}]} {
    %c0 = arith.constant 0 : index
    %c0_0 = arith.constant 0 : index
    %c0_1 = arith.constant 0 : index
    %0 = vector.load %arg1[%c0, %c0_0, %c0_1] : memref<1x8x128xf32, #tpu.memory_space<vmem>>, vector<1x8x128xf32>
    %1 = vector.shape_cast %0 : vector<1x8x128xf32> to vector<8x128xf32>
    %c0_2 = arith.constant 0 : index
    %c0_3 = arith.constant 0 : index
    %c0_4 = arith.constant 0 : index
    %2 = vector.load %arg2[%c0_2, %c0_3, %c0_4] : memref<1x16x128xf32, #tpu.memory_space<vmem>>, vector<1x16x128xf32>
    %3 = vector.shape_cast %2 : vector<1x16x128xf32> to vector<16x128xf32>
    %4 = arith.truncf %1 : vector<8x128xf32> to vector<8x128xbf16>
    %c0_5 = arith.constant 0 : index
    %c0_6 = arith.constant 0 : index
    %5 = vector.load %arg3[%c0_5, %c0_6] : memref<128x384xbf16, #tpu.memory_space<vmem>>, vector<128x384xbf16>
    %cst = arith.constant dense<0.000000e+00> : vector<8x384xf32>
    %6 = tpu.matmul %4, %5, %cst {dimension_numbers = #tpu.dot_dimension_numbers<[1], [0], [0], [1], [0, 0, 1, 1], [], []>} : vector<8x128xbf16>, vector<128x384xbf16>, vector<8x384xf32> -> vector<8x384xf32>
    %c0_7 = arith.constant 0 : index
    %c0_8 = arith.constant 0 : index
    %7 = vector.load %arg4[%c0_7, %c0_8] : memref<1x384xf32, #tpu.memory_space<vmem>>, vector<1x384xf32>
    %8 = vector.broadcast %7 : vector<1x384xf32> to vector<8x384xf32>
    %9 = arith.addf %6, %8 : vector<8x384xf32>
    %10 = vector.extract_strided_slice %9 {offsets = [0, 0], sizes = [8, 128], strides = [1, 1]} : vector<8x384xf32> to vector<8x128xf32>
    %11 = vector.extract_strided_slice %9 {offsets = [0, 128], sizes = [8, 128], strides = [1, 1]} : vector<8x384xf32> to vector<8x128xf32>
    %12 = vector.extract_strided_slice %9 {offsets = [0, 256], sizes = [8, 128], strides = [1, 1]} : vector<8x384xf32> to vector<8x128xf32>
    %13 = vector.extract_strided_slice %10 {offsets = [0, 0], sizes = [8, 32], strides = [1, 1]} : vector<8x128xf32> to vector<8x32xf32>
    %14 = arith.truncf %13 : vector<8x32xf32> to vector<8x32xbf16>
    %15 = vector.extract_strided_slice %11 {offsets = [0, 0], sizes = [8, 32], strides = [1, 1]} : vector<8x128xf32> to vector<8x32xf32>
    %16 = arith.truncf %15 : vector<8x32xf32> to vector<8x32xbf16>
    %17 = vector.extract_strided_slice %12 {offsets = [0, 0], sizes = [8, 32], strides = [1, 1]} : vector<8x128xf32> to vector<8x32xf32>
    %18 = arith.truncf %17 : vector<8x32xf32> to vector<8x32xbf16>
    %cst_9 = arith.constant dense<0.000000e+00> : vector<8x8xf32>
    %19 = tpu.matmul %14, %16, %cst_9 {dimension_numbers = #tpu.dot_dimension_numbers<[1], [1], [0], [0], [0, 0, 1, 0], [], []>} : vector<8x32xbf16>, vector<8x32xbf16>, vector<8x8xf32> -> vector<8x8xf32>
    %cst_10 = arith.constant 0.176776692 : f32
    %20 = vector.broadcast %cst_10 : f32 to vector<8x8xf32>
    %21 = arith.mulf %19, %20 : vector<8x8xf32>
    %cst_11 = arith.constant dense<0xFF800000> : vector<8xf32>
    %22 = vector.multi_reduction <maximumf>, %21, %cst_11 [1] : vector<8x8xf32> to vector<8xf32>
    %23 = vector.shape_cast %22 : vector<8xf32> to vector<8x1xf32>
    %24 = vector.broadcast %23 : vector<8x1xf32> to vector<8x8xf32>
    %25 = arith.subf %21, %24 : vector<8x8xf32>
    %26 = math.exp %25 : vector<8x8xf32>
    %cst_12 = arith.constant dense<0.000000e+00> : vector<8xf32>
    %27 = vector.multi_reduction <add>, %26, %cst_12 [1] : vector<8x8xf32> to vector<8xf32>
    %28 = vector.shape_cast %27 : vector<8xf32> to vector<8x1xf32>
    %29 = tpu.reciprocal %28 {approx = true} : vector<8x1xf32> -> vector<8x1xf32>
    %30 = vector.broadcast %29 : vector<8x1xf32> to vector<8x8xf32>
    %31 = arith.mulf %26, %30 : vector<8x8xf32>
    %32 = arith.truncf %31 : vector<8x8xf32> to vector<8x8xbf16>
    %cst_13 = arith.constant dense<0.000000e+00> : vector<8x32xf32>
    %33 = tpu.matmul %32, %18, %cst_13 {dimension_numbers = #tpu.dot_dimension_numbers<[1], [0], [0], [1], [0, 0, 1, 1], [], []>} : vector<8x8xbf16>, vector<8x32xbf16>, vector<8x32xf32> -> vector<8x32xf32>
    %c0_14 = arith.constant 0 : index
    %c0_15 = arith.constant 0 : index
    %34 = vector.load %arg22[%c0_14, %c0_15] : memref<8x128xf32, #tpu.memory_space<vmem>>, vector<8x32xf32>
    tpu.vector_store %arg22[%c0_14, %c0_15], %33 {strides = array<i32>} : memref<8x128xf32, #tpu.memory_space<vmem>>, vector<8x32xf32>,
    %35 = vector.extract_strided_slice %10 {offsets = [0, 32], sizes = [8, 32], strides = [1, 1]} : vector<8x128xf32> to vector<8x32xf32>
    %36 = arith.truncf %35 : vector<8x32xf32> to vector<8x32xbf16>
    %37 = vector.extract_strided_slice %11 {offsets = [0, 32], sizes = [8, 32], strides = [1, 1]} : vector<8x128xf32> to vector<8x32xf32>
    %38 = arith.truncf %37 : vector<8x32xf32> to vector<8x32xbf16>
    %39 = vector.extract_strided_slice %12 {offsets = [0, 32], sizes = [8, 32], strides = [1, 1]} : vector<8x128xf32> to vector<8x32xf32>
    %40 = arith.truncf %39 : vector<8x32xf32> to vector<8x32xbf16>
    %cst_16 = arith.constant dense<0.000000e+00> : vector<8x8xf32>
    %41 = tpu.matmul %36, %38, %cst_16 {dimension_numbers = #tpu.dot_dimension_numbers<[1], [1], [0], [0], [0, 0, 1, 0], [], []>} : vector<8x32xbf16>, vector<8x32xbf16>, vector<8x8xf32> -> vector<8x8xf32>
    %cst_17 = arith.constant 0.176776692 : f32
    %42 = vector.broadcast %cst_17 : f32 to vector<8x8xf32>
    %43 = arith.mulf %41, %42 : vector<8x8xf32>
    %cst_18 = arith.constant dense<0xFF800000> : vector<8xf32>
    %44 = vector.multi_reduction <maximumf>, %43, %cst_18 [1] : vector<8x8xf32> to vector<8xf32>
    %45 = vector.shape_cast %44 : vector<8xf32> to vector<8x1xf32>
    %46 = vector.broadcast %45 : vector<8x1xf32> to vector<8x8xf32>
    %47 = arith.subf %43, %46 : vector<8x8xf32>
    %48 = math.exp %47 : vector<8x8xf32>
    %cst_19 = arith.constant dense<0.000000e+00> : vector<8xf32>
    %49 = vector.multi_reduction <add>, %48, %cst_19 [1] : vector<8x8xf32> to vector<8xf32>
    %50 = vector.shape_cast %49 : vector<8xf32> to vector<8x1xf32>
    %51 = tpu.reciprocal %50 {approx = true} : vector<8x1xf32> -> vector<8x1xf32>
    %52 = vector.broadcast %51 : vector<8x1xf32> to vector<8x8xf32>
    %53 = arith.mulf %48, %52 : vector<8x8xf32>
    %54 = arith.truncf %53 : vector<8x8xf32> to vector<8x8xbf16>
    %cst_20 = arith.constant dense<0.000000e+00> : vector<8x32xf32>
    %55 = tpu.matmul %54, %40, %cst_20 {dimension_numbers = #tpu.dot_dimension_numbers<[1], [0], [0], [1], [0, 0, 1, 1], [], []>} : vector<8x8xbf16>, vector<8x32xbf16>, vector<8x32xf32> -> vector<8x32xf32>
    %c0_21 = arith.constant 0 : index
    %c32 = arith.constant 32 : index
    %56 = vector.load %arg22[%c0_21, %c32] : memref<8x128xf32, #tpu.memory_space<vmem>>, vector<8x32xf32>
    tpu.vector_store %arg22[%c0_21, %c32], %55 {strides = array<i32>} : memref<8x128xf32, #tpu.memory_space<vmem>>, vector<8x32xf32>,
    %57 = vector.extract_strided_slice %10 {offsets = [0, 64], sizes = [8, 32], strides = [1, 1]} : vector<8x128xf32> to vector<8x32xf32>
    %58 = arith.truncf %57 : vector<8x32xf32> to vector<8x32xbf16>
    %59 = vector.extract_strided_slice %11 {offsets = [0, 64], sizes = [8, 32], strides = [1, 1]} : vector<8x128xf32> to vector<8x32xf32>
    %60 = arith.truncf %59 : vector<8x32xf32> to vector<8x32xbf16>
    %61 = vector.extract_strided_slice %12 {offsets = [0, 64], sizes = [8, 32], strides = [1, 1]} : vector<8x128xf32> to vector<8x32xf32>
    %62 = arith.truncf %61 : vector<8x32xf32> to vector<8x32xbf16>
    %cst_22 = arith.constant dense<0.000000e+00> : vector<8x8xf32>
    %63 = tpu.matmul %58, %60, %cst_22 {dimension_numbers = #tpu.dot_dimension_numbers<[1], [1], [0], [0], [0, 0, 1, 0], [], []>} : vector<8x32xbf16>, vector<8x32xbf16>, vector<8x8xf32> -> vector<8x8xf32>
    %cst_23 = arith.constant 0.176776692 : f32
    %64 = vector.broadcast %cst_23 : f32 to vector<8x8xf32>
    %65 = arith.mulf %63, %64 : vector<8x8xf32>
    %cst_24 = arith.constant dense<0xFF800000> : vector<8xf32>
    %66 = vector.multi_reduction <maximumf>, %65, %cst_24 [1] : vector<8x8xf32> to vector<8xf32>
    %67 = vector.shape_cast %66 : vector<8xf32> to vector<8x1xf32>
    %68 = vector.broadcast %67 : vector<8x1xf32> to vector<8x8xf32>
    %69 = arith.subf %65, %68 : vector<8x8xf32>
    %70 = math.exp %69 : vector<8x8xf32>
    %cst_25 = arith.constant dense<0.000000e+00> : vector<8xf32>
    %71 = vector.multi_reduction <add>, %70, %cst_25 [1] : vector<8x8xf32> to vector<8xf32>
    %72 = vector.shape_cast %71 : vector<8xf32> to vector<8x1xf32>
    %73 = tpu.reciprocal %72 {approx = true} : vector<8x1xf32> -> vector<8x1xf32>
    %74 = vector.broadcast %73 : vector<8x1xf32> to vector<8x8xf32>
    %75 = arith.mulf %70, %74 : vector<8x8xf32>
    %76 = arith.truncf %75 : vector<8x8xf32> to vector<8x8xbf16>
    %cst_26 = arith.constant dense<0.000000e+00> : vector<8x32xf32>
    %77 = tpu.matmul %76, %62, %cst_26 {dimension_numbers = #tpu.dot_dimension_numbers<[1], [0], [0], [1], [0, 0, 1, 1], [], []>} : vector<8x8xbf16>, vector<8x32xbf16>, vector<8x32xf32> -> vector<8x32xf32>
    %c0_27 = arith.constant 0 : index
    %c64 = arith.constant 64 : index
    %78 = vector.load %arg22[%c0_27, %c64] : memref<8x128xf32, #tpu.memory_space<vmem>>, vector<8x32xf32>
    tpu.vector_store %arg22[%c0_27, %c64], %77 {strides = array<i32>} : memref<8x128xf32, #tpu.memory_space<vmem>>, vector<8x32xf32>,
    %79 = vector.extract_strided_slice %10 {offsets = [0, 96], sizes = [8, 32], strides = [1, 1]} : vector<8x128xf32> to vector<8x32xf32>
    %80 = arith.truncf %79 : vector<8x32xf32> to vector<8x32xbf16>
    %81 = vector.extract_strided_slice %11 {offsets = [0, 96], sizes = [8, 32], strides = [1, 1]} : vector<8x128xf32> to vector<8x32xf32>
    %82 = arith.truncf %81 : vector<8x32xf32> to vector<8x32xbf16>
    %83 = vector.extract_strided_slice %12 {offsets = [0, 96], sizes = [8, 32], strides = [1, 1]} : vector<8x128xf32> to vector<8x32xf32>
    %84 = arith.truncf %83 : vector<8x32xf32> to vector<8x32xbf16>
    %cst_28 = arith.constant dense<0.000000e+00> : vector<8x8xf32>
    %85 = tpu.matmul %80, %82, %cst_28 {dimension_numbers = #tpu.dot_dimension_numbers<[1], [1], [0], [0], [0, 0, 1, 0], [], []>} : vector<8x32xbf16>, vector<8x32xbf16>, vector<8x8xf32> -> vector<8x8xf32>
    %cst_29 = arith.constant 0.176776692 : f32
    %86 = vector.broadcast %cst_29 : f32 to vector<8x8xf32>
    %87 = arith.mulf %85, %86 : vector<8x8xf32>
    %cst_30 = arith.constant dense<0xFF800000> : vector<8xf32>
    %88 = vector.multi_reduction <maximumf>, %87, %cst_30 [1] : vector<8x8xf32> to vector<8xf32>
    %89 = vector.shape_cast %88 : vector<8xf32> to vector<8x1xf32>
    %90 = vector.broadcast %89 : vector<8x1xf32> to vector<8x8xf32>
    %91 = arith.subf %87, %90 : vector<8x8xf32>
    %92 = math.exp %91 : vector<8x8xf32>
    %cst_31 = arith.constant dense<0.000000e+00> : vector<8xf32>
    %93 = vector.multi_reduction <add>, %92, %cst_31 [1] : vector<8x8xf32> to vector<8xf32>
    %94 = vector.shape_cast %93 : vector<8xf32> to vector<8x1xf32>
    %95 = tpu.reciprocal %94 {approx = true} : vector<8x1xf32> -> vector<8x1xf32>
    %96 = vector.broadcast %95 : vector<8x1xf32> to vector<8x8xf32>
    %97 = arith.mulf %92, %96 : vector<8x8xf32>
    %98 = arith.truncf %97 : vector<8x8xf32> to vector<8x8xbf16>
    %cst_32 = arith.constant dense<0.000000e+00> : vector<8x32xf32>
    %99 = tpu.matmul %98, %84, %cst_32 {dimension_numbers = #tpu.dot_dimension_numbers<[1], [0], [0], [1], [0, 0, 1, 1], [], []>} : vector<8x8xbf16>, vector<8x32xbf16>, vector<8x32xf32> -> vector<8x32xf32>
    %c0_33 = arith.constant 0 : index
    %c96 = arith.constant 96 : index
    %100 = vector.load %arg22[%c0_33, %c96] : memref<8x128xf32, #tpu.memory_space<vmem>>, vector<8x32xf32>
    tpu.vector_store %arg22[%c0_33, %c96], %99 {strides = array<i32>} : memref<8x128xf32, #tpu.memory_space<vmem>>, vector<8x32xf32>,
    %c0_34 = arith.constant 0 : index
    %c0_35 = arith.constant 0 : index
    %101 = vector.load %arg22[%c0_34, %c0_35] : memref<8x128xf32, #tpu.memory_space<vmem>>, vector<8x128xf32>
    %102 = arith.truncf %101 : vector<8x128xf32> to vector<8x128xbf16>
    %c0_36 = arith.constant 0 : index
    %c0_37 = arith.constant 0 : index
    %103 = vector.load %arg5[%c0_36, %c0_37] : memref<128x128xbf16, #tpu.memory_space<vmem>>, vector<128x128xbf16>
    %cst_38 = arith.constant dense<0.000000e+00> : vector<8x128xf32>
    %104 = tpu.matmul %102, %103, %cst_38 {dimension_numbers = #tpu.dot_dimension_numbers<[1], [0], [0], [1], [0, 0, 1, 1], [], []>} : vector<8x128xbf16>, vector<128x128xbf16>, vector<8x128xf32> -> vector<8x128xf32>
    %c0_39 = arith.constant 0 : index
    %c0_40 = arith.constant 0 : index
    %105 = vector.load %arg6[%c0_39, %c0_40] : memref<1x128xf32, #tpu.memory_space<vmem>>, vector<1x128xf32>
    %106 = vector.broadcast %105 : vector<1x128xf32> to vector<8x128xf32>
    %107 = arith.addf %104, %106 : vector<8x128xf32>
    %108 = arith.addf %1, %107 : vector<8x128xf32>
    %cst_41 = arith.constant dense<0.000000e+00> : vector<8xf32>
    %109 = vector.multi_reduction <add>, %108, %cst_41 [1] : vector<8x128xf32> to vector<8xf32>
    %110 = vector.shape_cast %109 : vector<8xf32> to vector<8x1xf32>
    %cst_42 = arith.constant 1.280000e+02 : f32
    %111 = vector.broadcast %cst_42 : f32 to vector<8x1xf32>
    %112 = arith.divf %110, %111 : vector<8x1xf32>
    %113 = vector.broadcast %112 : vector<8x1xf32> to vector<8x128xf32>
    %114 = arith.subf %108, %113 : vector<8x128xf32>
    %115 = arith.mulf %114, %114 : vector<8x128xf32>
    %cst_43 = arith.constant dense<0.000000e+00> : vector<8xf32>
    %116 = vector.multi_reduction <add>, %115, %cst_43 [1] : vector<8x128xf32> to vector<8xf32>
    %117 = vector.shape_cast %116 : vector<8xf32> to vector<8x1xf32>
    %cst_44 = arith.constant 1.280000e+02 : f32
    %118 = vector.broadcast %cst_44 : f32 to vector<8x1xf32>
    %119 = arith.divf %117, %118 : vector<8x1xf32>
    %120 = vector.broadcast %112 : vector<8x1xf32> to vector<8x128xf32>
    %121 = arith.subf %108, %120 : vector<8x128xf32>
    %cst_45 = arith.constant 9.99999974E-6 : f32
    %122 = vector.broadcast %cst_45 : f32 to vector<8x1xf32>
    %123 = arith.addf %119, %122 : vector<8x1xf32>
    %124 = math.rsqrt %123 : vector<8x1xf32>
    %125 = vector.broadcast %124 : vector<8x1xf32> to vector<8x128xf32>
    %126 = arith.mulf %121, %125 : vector<8x128xf32>
    %c0_46 = arith.constant 0 : index
    %c0_47 = arith.constant 0 : index
    %127 = vector.load %arg7[%c0_46, %c0_47] : memref<1x128xf32, #tpu.memory_space<vmem>>, vector<1x128xf32>
    %128 = vector.broadcast %127 : vector<1x128xf32> to vector<8x128xf32>
    %129 = arith.mulf %126, %128 : vector<8x128xf32>
    %c0_48 = arith.constant 0 : index
    %c0_49 = arith.constant 0 : index
    %130 = vector.load %arg8[%c0_48, %c0_49] : memref<1x128xf32, #tpu.memory_space<vmem>>, vector<1x128xf32>
    %131 = vector.broadcast %130 : vector<1x128xf32> to vector<8x128xf32>
    %132 = arith.addf %129, %131 : vector<8x128xf32>
    %133 = arith.truncf %3 : vector<16x128xf32> to vector<16x128xbf16>
    %c0_50 = arith.constant 0 : index
    %c0_51 = arith.constant 0 : index
    %134 = vector.load %arg9[%c0_50, %c0_51] : memref<128x256xbf16, #tpu.memory_space<vmem>>, vector<128x256xbf16>
    %cst_52 = arith.constant dense<0.000000e+00> : vector<16x256xf32>
    %135 = tpu.matmul %133, %134, %cst_52 {dimension_numbers = #tpu.dot_dimension_numbers<[1], [0], [0], [1], [0, 0, 1, 1], [], []>} : vector<16x128xbf16>, vector<128x256xbf16>, vector<16x256xf32> -> vector<16x256xf32>
    %c0_53 = arith.constant 0 : index
    %c0_54 = arith.constant 0 : index
    %136 = vector.load %arg10[%c0_53, %c0_54] : memref<1x256xf32, #tpu.memory_space<vmem>>, vector<1x256xf32>
    %137 = vector.broadcast %136 : vector<1x256xf32> to vector<16x256xf32>
    %138 = arith.addf %135, %137 : vector<16x256xf32>
    %139 = vector.extract_strided_slice %138 {offsets = [0, 0], sizes = [16, 128], strides = [1, 1]} : vector<16x256xf32> to vector<16x128xf32>
    %140 = vector.extract_strided_slice %138 {offsets = [0, 128], sizes = [16, 128], strides = [1, 1]} : vector<16x256xf32> to vector<16x128xf32>
    %141 = vector.extract_strided_slice %132 {offsets = [0, 0], sizes = [8, 32], strides = [1, 1]} : vector<8x128xf32> to vector<8x32xf32>
    %142 = arith.truncf %141 : vector<8x32xf32> to vector<8x32xbf16>
    %143 = vector.extract_strided_slice %139 {offsets = [0, 0], sizes = [16, 32], strides = [1, 1]} : vector<16x128xf32> to vector<16x32xf32>
    %144 = arith.truncf %143 : vector<16x32xf32> to vector<16x32xbf16>
    %145 = vector.extract_strided_slice %140 {offsets = [0, 0], sizes = [16, 32], strides = [1, 1]} : vector<16x128xf32> to vector<16x32xf32>
    %146 = arith.truncf %145 : vector<16x32xf32> to vector<16x32xbf16>
    %cst_55 = arith.constant dense<0.000000e+00> : vector<8x16xf32>
    %147 = tpu.matmul %142, %144, %cst_55 {dimension_numbers = #tpu.dot_dimension_numbers<[1], [1], [0], [0], [0, 0, 1, 0], [], []>} : vector<8x32xbf16>, vector<16x32xbf16>, vector<8x16xf32> -> vector<8x16xf32>
    %cst_56 = arith.constant 0.176776692 : f32
    %148 = vector.broadcast %cst_56 : f32 to vector<8x16xf32>
    %149 = arith.mulf %147, %148 : vector<8x16xf32>
    %cst_57 = arith.constant dense<0xFF800000> : vector<8xf32>
    %150 = vector.multi_reduction <maximumf>, %149, %cst_57 [1] : vector<8x16xf32> to vector<8xf32>
    %151 = vector.shape_cast %150 : vector<8xf32> to vector<8x1xf32>
    %152 = vector.broadcast %151 : vector<8x1xf32> to vector<8x16xf32>
    %153 = arith.subf %149, %152 : vector<8x16xf32>
    %154 = math.exp %153 : vector<8x16xf32>
    %cst_58 = arith.constant dense<0.000000e+00> : vector<8xf32>
    %155 = vector.multi_reduction <add>, %154, %cst_58 [1] : vector<8x16xf32> to vector<8xf32>
    %156 = vector.shape_cast %155 : vector<8xf32> to vector<8x1xf32>
    %157 = tpu.reciprocal %156 {approx = true} : vector<8x1xf32> -> vector<8x1xf32>
    %158 = vector.broadcast %157 : vector<8x1xf32> to vector<8x16xf32>
    %159 = arith.mulf %154, %158 : vector<8x16xf32>
    %160 = arith.truncf %159 : vector<8x16xf32> to vector<8x16xbf16>
    %cst_59 = arith.constant dense<0.000000e+00> : vector<8x32xf32>
    %161 = tpu.matmul %160, %146, %cst_59 {dimension_numbers = #tpu.dot_dimension_numbers<[1], [0], [0], [1], [0, 0, 1, 1], [], []>} : vector<8x16xbf16>, vector<16x32xbf16>, vector<8x32xf32> -> vector<8x32xf32>
    %c0_60 = arith.constant 0 : index
    %c0_61 = arith.constant 0 : index
    %162 = vector.load %arg22[%c0_60, %c0_61] : memref<8x128xf32, #tpu.memory_space<vmem>>, vector<8x32xf32>
    tpu.vector_store %arg22[%c0_60, %c0_61], %161 {strides = array<i32>} : memref<8x128xf32, #tpu.memory_space<vmem>>, vector<8x32xf32>,
    %163 = vector.extract_strided_slice %132 {offsets = [0, 32], sizes = [8, 32], strides = [1, 1]} : vector<8x128xf32> to vector<8x32xf32>
    %164 = arith.truncf %163 : vector<8x32xf32> to vector<8x32xbf16>
    %165 = vector.extract_strided_slice %139 {offsets = [0, 32], sizes = [16, 32], strides = [1, 1]} : vector<16x128xf32> to vector<16x32xf32>
    %166 = arith.truncf %165 : vector<16x32xf32> to vector<16x32xbf16>
    %167 = vector.extract_strided_slice %140 {offsets = [0, 32], sizes = [16, 32], strides = [1, 1]} : vector<16x128xf32> to vector<16x32xf32>
    %168 = arith.truncf %167 : vector<16x32xf32> to vector<16x32xbf16>
    %cst_62 = arith.constant dense<0.000000e+00> : vector<8x16xf32>
    %169 = tpu.matmul %164, %166, %cst_62 {dimension_numbers = #tpu.dot_dimension_numbers<[1], [1], [0], [0], [0, 0, 1, 0], [], []>} : vector<8x32xbf16>, vector<16x32xbf16>, vector<8x16xf32> -> vector<8x16xf32>
    %cst_63 = arith.constant 0.176776692 : f32
    %170 = vector.broadcast %cst_63 : f32 to vector<8x16xf32>
    %171 = arith.mulf %169, %170 : vector<8x16xf32>
    %cst_64 = arith.constant dense<0xFF800000> : vector<8xf32>
    %172 = vector.multi_reduction <maximumf>, %171, %cst_64 [1] : vector<8x16xf32> to vector<8xf32>
    %173 = vector.shape_cast %172 : vector<8xf32> to vector<8x1xf32>
    %174 = vector.broadcast %173 : vector<8x1xf32> to vector<8x16xf32>
    %175 = arith.subf %171, %174 : vector<8x16xf32>
    %176 = math.exp %175 : vector<8x16xf32>
    %cst_65 = arith.constant dense<0.000000e+00> : vector<8xf32>
    %177 = vector.multi_reduction <add>, %176, %cst_65 [1] : vector<8x16xf32> to vector<8xf32>
    %178 = vector.shape_cast %177 : vector<8xf32> to vector<8x1xf32>
    %179 = tpu.reciprocal %178 {approx = true} : vector<8x1xf32> -> vector<8x1xf32>
    %180 = vector.broadcast %179 : vector<8x1xf32> to vector<8x16xf32>
    %181 = arith.mulf %176, %180 : vector<8x16xf32>
    %182 = arith.truncf %181 : vector<8x16xf32> to vector<8x16xbf16>
    %cst_66 = arith.constant dense<0.000000e+00> : vector<8x32xf32>
    %183 = tpu.matmul %182, %168, %cst_66 {dimension_numbers = #tpu.dot_dimension_numbers<[1], [0], [0], [1], [0, 0, 1, 1], [], []>} : vector<8x16xbf16>, vector<16x32xbf16>, vector<8x32xf32> -> vector<8x32xf32>
    %c0_67 = arith.constant 0 : index
    %c32_68 = arith.constant 32 : index
    %184 = vector.load %arg22[%c0_67, %c32_68] : memref<8x128xf32, #tpu.memory_space<vmem>>, vector<8x32xf32>
    tpu.vector_store %arg22[%c0_67, %c32_68], %183 {strides = array<i32>} : memref<8x128xf32, #tpu.memory_space<vmem>>, vector<8x32xf32>,
    %185 = vector.extract_strided_slice %132 {offsets = [0, 64], sizes = [8, 32], strides = [1, 1]} : vector<8x128xf32> to vector<8x32xf32>
    %186 = arith.truncf %185 : vector<8x32xf32> to vector<8x32xbf16>
    %187 = vector.extract_strided_slice %139 {offsets = [0, 64], sizes = [16, 32], strides = [1, 1]} : vector<16x128xf32> to vector<16x32xf32>
    %188 = arith.truncf %187 : vector<16x32xf32> to vector<16x32xbf16>
    %189 = vector.extract_strided_slice %140 {offsets = [0, 64], sizes = [16, 32], strides = [1, 1]} : vector<16x128xf32> to vector<16x32xf32>
    %190 = arith.truncf %189 : vector<16x32xf32> to vector<16x32xbf16>
    %cst_69 = arith.constant dense<0.000000e+00> : vector<8x16xf32>
    %191 = tpu.matmul %186, %188, %cst_69 {dimension_numbers = #tpu.dot_dimension_numbers<[1], [1], [0], [0], [0, 0, 1, 0], [], []>} : vector<8x32xbf16>, vector<16x32xbf16>, vector<8x16xf32> -> vector<8x16xf32>
    %cst_70 = arith.constant 0.176776692 : f32
    %192 = vector.broadcast %cst_70 : f32 to vector<8x16xf32>
    %193 = arith.mulf %191, %192 : vector<8x16xf32>
    %cst_71 = arith.constant dense<0xFF800000> : vector<8xf32>
    %194 = vector.multi_reduction <maximumf>, %193, %cst_71 [1] : vector<8x16xf32> to vector<8xf32>
    %195 = vector.shape_cast %194 : vector<8xf32> to vector<8x1xf32>
    %196 = vector.broadcast %195 : vector<8x1xf32> to vector<8x16xf32>
    %197 = arith.subf %193, %196 : vector<8x16xf32>
    %198 = math.exp %197 : vector<8x16xf32>
    %cst_72 = arith.constant dense<0.000000e+00> : vector<8xf32>
    %199 = vector.multi_reduction <add>, %198, %cst_72 [1] : vector<8x16xf32> to vector<8xf32>
    %200 = vector.shape_cast %199 : vector<8xf32> to vector<8x1xf32>
    %201 = tpu.reciprocal %200 {approx = true} : vector<8x1xf32> -> vector<8x1xf32>
    %202 = vector.broadcast %201 : vector<8x1xf32> to vector<8x16xf32>
    %203 = arith.mulf %198, %202 : vector<8x16xf32>
    %204 = arith.truncf %203 : vector<8x16xf32> to vector<8x16xbf16>
    %cst_73 = arith.constant dense<0.000000e+00> : vector<8x32xf32>
    %205 = tpu.matmul %204, %190, %cst_73 {dimension_numbers = #tpu.dot_dimension_numbers<[1], [0], [0], [1], [0, 0, 1, 1], [], []>} : vector<8x16xbf16>, vector<16x32xbf16>, vector<8x32xf32> -> vector<8x32xf32>
    %c0_74 = arith.constant 0 : index
    %c64_75 = arith.constant 64 : index
    %206 = vector.load %arg22[%c0_74, %c64_75] : memref<8x128xf32, #tpu.memory_space<vmem>>, vector<8x32xf32>
    tpu.vector_store %arg22[%c0_74, %c64_75], %205 {strides = array<i32>} : memref<8x128xf32, #tpu.memory_space<vmem>>, vector<8x32xf32>,
    %207 = vector.extract_strided_slice %132 {offsets = [0, 96], sizes = [8, 32], strides = [1, 1]} : vector<8x128xf32> to vector<8x32xf32>
    %208 = arith.truncf %207 : vector<8x32xf32> to vector<8x32xbf16>
    %209 = vector.extract_strided_slice %139 {offsets = [0, 96], sizes = [16, 32], strides = [1, 1]} : vector<16x128xf32> to vector<16x32xf32>
    %210 = arith.truncf %209 : vector<16x32xf32> to vector<16x32xbf16>
    %211 = vector.extract_strided_slice %140 {offsets = [0, 96], sizes = [16, 32], strides = [1, 1]} : vector<16x128xf32> to vector<16x32xf32>
    %212 = arith.truncf %211 : vector<16x32xf32> to vector<16x32xbf16>
    %cst_76 = arith.constant dense<0.000000e+00> : vector<8x16xf32>
    %213 = tpu.matmul %208, %210, %cst_76 {dimension_numbers = #tpu.dot_dimension_numbers<[1], [1], [0], [0], [0, 0, 1, 0], [], []>} : vector<8x32xbf16>, vector<16x32xbf16>, vector<8x16xf32> -> vector<8x16xf32>
    %cst_77 = arith.constant 0.176776692 : f32
    %214 = vector.broadcast %cst_77 : f32 to vector<8x16xf32>
    %215 = arith.mulf %213, %214 : vector<8x16xf32>
    %cst_78 = arith.constant dense<0xFF800000> : vector<8xf32>
    %216 = vector.multi_reduction <maximumf>, %215, %cst_78 [1] : vector<8x16xf32> to vector<8xf32>
    %217 = vector.shape_cast %216 : vector<8xf32> to vector<8x1xf32>
    %218 = vector.broadcast %217 : vector<8x1xf32> to vector<8x16xf32>
    %219 = arith.subf %215, %218 : vector<8x16xf32>
    %220 = math.exp %219 : vector<8x16xf32>
    %cst_79 = arith.constant dense<0.000000e+00> : vector<8xf32>
    %221 = vector.multi_reduction <add>, %220, %cst_79 [1] : vector<8x16xf32> to vector<8xf32>
    %222 = vector.shape_cast %221 : vector<8xf32> to vector<8x1xf32>
    %223 = tpu.reciprocal %222 {approx = true} : vector<8x1xf32> -> vector<8x1xf32>
    %224 = vector.broadcast %223 : vector<8x1xf32> to vector<8x16xf32>
    %225 = arith.mulf %220, %224 : vector<8x16xf32>
    %226 = arith.truncf %225 : vector<8x16xf32> to vector<8x16xbf16>
    %cst_80 = arith.constant dense<0.000000e+00> : vector<8x32xf32>
    %227 = tpu.matmul %226, %212, %cst_80 {dimension_numbers = #tpu.dot_dimension_numbers<[1], [0], [0], [1], [0, 0, 1, 1], [], []>} : vector<8x16xbf16>, vector<16x32xbf16>, vector<8x32xf32> -> vector<8x32xf32>
    %c0_81 = arith.constant 0 : index
    %c96_82 = arith.constant 96 : index
    %228 = vector.load %arg22[%c0_81, %c96_82] : memref<8x128xf32, #tpu.memory_space<vmem>>, vector<8x32xf32>
    tpu.vector_store %arg22[%c0_81, %c96_82], %227 {strides = array<i32>} : memref<8x128xf32, #tpu.memory_space<vmem>>, vector<8x32xf32>,
    %c0_83 = arith.constant 0 : index
    %c0_84 = arith.constant 0 : index
    %229 = vector.load %arg22[%c0_83, %c0_84] : memref<8x128xf32, #tpu.memory_space<vmem>>, vector<8x128xf32>
    %230 = arith.truncf %229 : vector<8x128xf32> to vector<8x128xbf16>
    %c0_85 = arith.constant 0 : index
    %c0_86 = arith.constant 0 : index
    %231 = vector.load %arg11[%c0_85, %c0_86] : memref<128x128xbf16, #tpu.memory_space<vmem>>, vector<128x128xbf16>
    %cst_87 = arith.constant dense<0.000000e+00> : vector<8x128xf32>
    %232 = tpu.matmul %230, %231, %cst_87 {dimension_numbers = #tpu.dot_dimension_numbers<[1], [0], [0], [1], [0, 0, 1, 1], [], []>} : vector<8x128xbf16>, vector<128x128xbf16>, vector<8x128xf32> -> vector<8x128xf32>
    %c0_88 = arith.constant 0 : index
    %c0_89 = arith.constant 0 : index
    %233 = vector.load %arg12[%c0_88, %c0_89] : memref<1x128xf32, #tpu.memory_space<vmem>>, vector<1x128xf32>
    %234 = vector.broadcast %233 : vector<1x128xf32> to vector<8x128xf32>
    %235 = arith.addf %232, %234 : vector<8x128xf32>
    %236 = arith.addf %132, %235 : vector<8x128xf32>
    %cst_90 = arith.constant dense<0.000000e+00> : vector<8xf32>
    %237 = vector.multi_reduction <add>, %236, %cst_90 [1] : vector<8x128xf32> to vector<8xf32>
    %238 = vector.shape_cast %237 : vector<8xf32> to vector<8x1xf32>
    %cst_91 = arith.constant 1.280000e+02 : f32
    %239 = vector.broadcast %cst_91 : f32 to vector<8x1xf32>
    %240 = arith.divf %238, %239 : vector<8x1xf32>
    %241 = vector.broadcast %240 : vector<8x1xf32> to vector<8x128xf32>
    %242 = arith.subf %236, %241 : vector<8x128xf32>
    %243 = arith.mulf %242, %242 : vector<8x128xf32>
    %cst_92 = arith.constant dense<0.000000e+00> : vector<8xf32>
    %244 = vector.multi_reduction <add>, %243, %cst_92 [1] : vector<8x128xf32> to vector<8xf32>
    %245 = vector.shape_cast %244 : vector<8xf32> to vector<8x1xf32>
    %cst_93 = arith.constant 1.280000e+02 : f32
    %246 = vector.broadcast %cst_93 : f32 to vector<8x1xf32>
    %247 = arith.divf %245, %246 : vector<8x1xf32>
    %248 = vector.broadcast %240 : vector<8x1xf32> to vector<8x128xf32>
    %249 = arith.subf %236, %248 : vector<8x128xf32>
    %cst_94 = arith.constant 9.99999974E-6 : f32
    %250 = vector.broadcast %cst_94 : f32 to vector<8x1xf32>
    %251 = arith.addf %247, %250 : vector<8x1xf32>
    %252 = math.rsqrt %251 : vector<8x1xf32>
    %253 = vector.broadcast %252 : vector<8x1xf32> to vector<8x128xf32>
    %254 = arith.mulf %249, %253 : vector<8x128xf32>
    %c0_95 = arith.constant 0 : index
    %c0_96 = arith.constant 0 : index
    %255 = vector.load %arg13[%c0_95, %c0_96] : memref<1x128xf32, #tpu.memory_space<vmem>>, vector<1x128xf32>
    %256 = vector.broadcast %255 : vector<1x128xf32> to vector<8x128xf32>
    %257 = arith.mulf %254, %256 : vector<8x128xf32>
    %c0_97 = arith.constant 0 : index
    %c0_98 = arith.constant 0 : index
    %258 = vector.load %arg14[%c0_97, %c0_98] : memref<1x128xf32, #tpu.memory_space<vmem>>, vector<1x128xf32>
    %259 = vector.broadcast %258 : vector<1x128xf32> to vector<8x128xf32>
    %260 = arith.addf %257, %259 : vector<8x128xf32>
    %261 = arith.truncf %260 : vector<8x128xf32> to vector<8x128xbf16>
    %c0_99 = arith.constant 0 : index
    %c0_100 = arith.constant 0 : index
    %262 = vector.load %arg15[%c0_99, %c0_100] : memref<128x256xbf16, #tpu.memory_space<vmem>>, vector<128x256xbf16>
    %cst_101 = arith.constant dense<0.000000e+00> : vector<8x256xf32>
    %263 = tpu.matmul %261, %262, %cst_101 {dimension_numbers = #tpu.dot_dimension_numbers<[1], [0], [0], [1], [0, 0, 1, 1], [], []>} : vector<8x128xbf16>, vector<128x256xbf16>, vector<8x256xf32> -> vector<8x256xf32>
    %c0_102 = arith.constant 0 : index
    %c0_103 = arith.constant 0 : index
    %264 = vector.load %arg16[%c0_102, %c0_103] : memref<1x256xf32, #tpu.memory_space<vmem>>, vector<1x256xf32>
    %265 = vector.broadcast %264 : vector<1x256xf32> to vector<8x256xf32>
    %266 = arith.addf %263, %265 : vector<8x256xf32>
    %cst_104 = arith.constant 0.000000e+00 : f32
    %267 = vector.broadcast %cst_104 : f32 to vector<8x256xf32>
    %268 = arith.maximumf %266, %267 : vector<8x256xf32>
    %269 = arith.truncf %268 : vector<8x256xf32> to vector<8x256xbf16>
    %c0_105 = arith.constant 0 : index
    %c0_106 = arith.constant 0 : index
    %270 = vector.load %arg17[%c0_105, %c0_106] : memref<256x128xbf16, #tpu.memory_space<vmem>>, vector<256x128xbf16>
    %cst_107 = arith.constant dense<0.000000e+00> : vector<8x128xf32>
    %271 = tpu.matmul %269, %270, %cst_107 {dimension_numbers = #tpu.dot_dimension_numbers<[1], [0], [0], [1], [0, 0, 1, 1], [], []>} : vector<8x256xbf16>, vector<256x128xbf16>, vector<8x128xf32> -> vector<8x128xf32>
    %c0_108 = arith.constant 0 : index
    %c0_109 = arith.constant 0 : index
    %272 = vector.load %arg18[%c0_108, %c0_109] : memref<1x128xf32, #tpu.memory_space<vmem>>, vector<1x128xf32>
    %273 = vector.broadcast %272 : vector<1x128xf32> to vector<8x128xf32>
    %274 = arith.addf %271, %273 : vector<8x128xf32>
    %275 = arith.addf %260, %274 : vector<8x128xf32>
    %cst_110 = arith.constant dense<0.000000e+00> : vector<8xf32>
    %276 = vector.multi_reduction <add>, %275, %cst_110 [1] : vector<8x128xf32> to vector<8xf32>
    %277 = vector.shape_cast %276 : vector<8xf32> to vector<8x1xf32>
    %cst_111 = arith.constant 1.280000e+02 : f32
    %278 = vector.broadcast %cst_111 : f32 to vector<8x1xf32>
    %279 = arith.divf %277, %278 : vector<8x1xf32>
    %280 = vector.broadcast %279 : vector<8x1xf32> to vector<8x128xf32>
    %281 = arith.subf %275, %280 : vector<8x128xf32>
    %282 = arith.mulf %281, %281 : vector<8x128xf32>
    %cst_112 = arith.constant dense<0.000000e+00> : vector<8xf32>
    %283 = vector.multi_reduction <add>, %282, %cst_112 [1] : vector<8x128xf32> to vector<8xf32>
    %284 = vector.shape_cast %283 : vector<8xf32> to vector<8x1xf32>
    %cst_113 = arith.constant 1.280000e+02 : f32
    %285 = vector.broadcast %cst_113 : f32 to vector<8x1xf32>
    %286 = arith.divf %284, %285 : vector<8x1xf32>
    %287 = vector.broadcast %279 : vector<8x1xf32> to vector<8x128xf32>
    %288 = arith.subf %275, %287 : vector<8x128xf32>
    %cst_114 = arith.constant 9.99999974E-6 : f32
    %289 = vector.broadcast %cst_114 : f32 to vector<8x1xf32>
    %290 = arith.addf %286, %289 : vector<8x1xf32>
    %291 = math.rsqrt %290 : vector<8x1xf32>
    %292 = vector.broadcast %291 : vector<8x1xf32> to vector<8x128xf32>
    %293 = arith.mulf %288, %292 : vector<8x128xf32>
    %c0_115 = arith.constant 0 : index
    %c0_116 = arith.constant 0 : index
    %294 = vector.load %arg19[%c0_115, %c0_116] : memref<1x128xf32, #tpu.memory_space<vmem>>, vector<1x128xf32>
    %295 = vector.broadcast %294 : vector<1x128xf32> to vector<8x128xf32>
    %296 = arith.mulf %293, %295 : vector<8x128xf32>
    %c0_117 = arith.constant 0 : index
    %c0_118 = arith.constant 0 : index
    %297 = vector.load %arg20[%c0_117, %c0_118] : memref<1x128xf32, #tpu.memory_space<vmem>>, vector<1x128xf32>
    %298 = vector.broadcast %297 : vector<1x128xf32> to vector<8x128xf32>
    %299 = arith.addf %296, %298 : vector<8x128xf32>
    %c0_119 = arith.constant 0 : index
    %c0_120 = arith.constant 0 : index
    %c0_121 = arith.constant 0 : index
    %300 = vector.load %arg21[%c0_119, %c0_120, %c0_121] : memref<1x8x128xf32, #tpu.memory_space<vmem>>, vector<1x8x128xf32>
    %301 = vector.shape_cast %300 : vector<1x8x128xf32> to vector<8x128xf32>
    %302 = vector.shape_cast %299 : vector<8x128xf32> to vector<1x8x128xf32>
    tpu.vector_store %arg21[%c0_119, %c0_120, %c0_121], %302 {strides = array<i32>} : memref<1x8x128xf32, #tpu.memory_space<vmem>>, vector<1x8x128xf32>,
    return
  }
  func.func @transform_0(%arg0: i32) -> (i32, i32, i32) {
    %c0_i32 = arith.constant 0 : i32
    %c0_i32_0 = arith.constant 0 : i32
    %c0_i32_1 = arith.constant 0 : i32
    return %arg0, %c0_i32, %c0_i32_0 : i32, i32, i32
  }
  func.func @transform_1(%arg0: i32) -> (i32, i32, i32) {
    %c0_i32 = arith.constant 0 : i32
    %c0_i32_0 = arith.constant 0 : i32
    %c0_i32_1 = arith.constant 0 : i32
    return %arg0, %c0_i32, %c0_i32_0 : i32, i32, i32
  }
  func.func @transform_2(%arg0: i32) -> (i32, i32) {
    %c0_i32 = arith.constant 0 : i32
    %c0_i32_0 = arith.constant 0 : i32
    %c0_i32_1 = arith.constant 0 : i32
    return %c0_i32, %c0_i32_0 : i32, i32
  }
  func.func @transform_3(%arg0: i32) -> (i32, i32) {
    %c0_i32 = arith.constant 0 : i32
    %c0_i32_0 = arith.constant 0 : i32
    %c0_i32_1 = arith.constant 0 : i32
    return %c0_i32, %c0_i32_0 : i32, i32
  }
  func.func @transform_4(%arg0: i32) -> (i32, i32) {
    %c0_i32 = arith.constant 0 : i32
    %c0_i32_0 = arith.constant 0 : i32
    %c0_i32_1 = arith.constant 0 : i32
    return %c0_i32, %c0_i32_0 : i32, i32
  }
  func.func @transform_5(%arg0: i32) -> (i32, i32) {
    %c0_i32 = arith.constant 0 : i32
    %c0_i32_0 = arith.constant 0 : i32
    %c0_i32_1 = arith.constant 0 : i32
    return %c0_i32, %c0_i32_0 : i32, i32
  }
  func.func @transform_6(%arg0: i32) -> (i32, i32) {
    %c0_i32 = arith.constant 0 : i32
    %c0_i32_0 = arith.constant 0 : i32
    %c0_i32_1 = arith.constant 0 : i32
    return %c0_i32, %c0_i32_0 : i32, i32
  }
  func.func @transform_7(%arg0: i32) -> (i32, i32) {
    %c0_i32 = arith.constant 0 : i32
    %c0_i32_0 = arith.constant 0 : i32
    %c0_i32_1 = arith.constant 0 : i32
    return %c0_i32, %c0_i32_0 : i32, i32
  }
  func.func @transform_8(%arg0: i32) -> (i32, i32) {
    %c0_i32 = arith.constant 0 : i32
    %c0_i32_0 = arith.constant 0 : i32
    %c0_i32_1 = arith.constant 0 : i32
    return %c0_i32, %c0_i32_0 : i32, i32
  }
  func.func @transform_9(%arg0: i32) -> (i32, i32) {
    %c0_i32 = arith.constant 0 : i32
    %c0_i32_0 = arith.constant 0 : i32
    %c0_i32_1 = arith.constant 0 : i32
    return %c0_i32, %c0_i32_0 : i32, i32
  }
  func.func @transform_10(%arg0: i32) -> (i32, i32) {
    %c0_i32 = arith.constant 0 : i32
    %c0_i32_0 = arith.constant 0 : i32
    %c0_i32_1 = arith.constant 0 : i32
    return %c0_i32, %c0_i32_0 : i32, i32
  }
  func.func @transform_11(%arg0: i32) -> (i32, i32) {
    %c0_i32 = arith.constant 0 : i32
    %c0_i32_0 = arith.constant 0 : i32
    %c0_i32_1 = arith.constant 0 : i32
    return %c0_i32, %c0_i32_0 : i32, i32
  }
  func.func @transform_12(%arg0: i32) -> (i32, i32) {
    %c0_i32 = arith.constant 0 : i32
    %c0_i32_0 = arith.constant 0 : i32
    %c0_i32_1 = arith.constant 0 : i32
    return %c0_i32, %c0_i32_0 : i32, i32
  }
  func.func @transform_13(%arg0: i32) -> (i32, i32) {
    %c0_i32 = arith.constant 0 : i32
    %c0_i32_0 = arith.constant 0 : i32
    %c0_i32_1 = arith.constant 0 : i32
    return %c0_i32, %c0_i32_0 : i32, i32
  }
  func.func @transform_14(%arg0: i32) -> (i32, i32) {
    %c0_i32 = arith.constant 0 : i32
    %c0_i32_0 = arith.constant 0 : i32
    %c0_i32_1 = arith.constant 0 : i32
    return %c0_i32, %c0_i32_0 : i32, i32
  }
  func.func @transform_15(%arg0: i32) -> (i32, i32) {
    %c0_i32 = arith.constant 0 : i32
    %c0_i32_0 = arith.constant 0 : i32
    %c0_i32_1 = arith.constant 0 : i32
    return %c0_i32, %c0_i32_0 : i32, i32
  }
  func.func @transform_16(%arg0: i32) -> (i32, i32) {
    %c0_i32 = arith.constant 0 : i32
    %c0_i32_0 = arith.constant 0 : i32
    %c0_i32_1 = arith.constant 0 : i32
    return %c0_i32, %c0_i32_0 : i32, i32
  }
  func.func @transform_17(%arg0: i32) -> (i32, i32) {
    %c0_i32 = arith.constant 0 : i32
    %c0_i32_0 = arith.constant 0 : i32
    %c0_i32_1 = arith.constant 0 : i32
    return %c0_i32, %c0_i32_0 : i32, i32
  }
  func.func @transform_18(%arg0: i32) -> (i32, i32) {
    %c0_i32 = arith.constant 0 : i32
    %c0_i32_0 = arith.constant 0 : i32
    %c0_i32_1 = arith.constant 0 : i32
    return %c0_i32, %c0_i32_0 : i32, i32
  }
  func.func @transform_19(%arg0: i32) -> (i32, i32) {
    %c0_i32 = arith.constant 0 : i32
    %c0_i32_0 = arith.constant 0 : i32
    %c0_i32_1 = arith.constant 0 : i32
    return %c0_i32, %c0_i32_0 : i32, i32
  }
  func.func @transform_20(%arg0: i32) -> (i32, i32, i32) {
    %c0_i32 = arith.constant 0 : i32
    %c0_i32_0 = arith.constant 0 : i32
    %c0_i32_1 = arith.constant 0 : i32
    return %arg0, %c0_i32, %c0_i32_0 : i32, i32, i32
  }
}

</mosaic_0001>

<bundles_post_ra>
// kernel: decoder_layer_forward.1
= control target key start
LH: loop header
LB: loop body
LE: loop exit
PB: predicated region body
PF: predicated region fallthrough
CT: control target
= control target key end

     0   :  { %s5540_s0 = inlined_call_operand.hbm [shape: f32[2,8,128], index: 0, kind: input, shape index: {}]   ;;  %s5541_s1 = inlined_call_operand.hbm [shape: f32[2,16,128], index: 1, kind: input, shape index: {}]   ;;  %s5542_s2 = inlined_call_operand.hbm [shape: bf16[128,384], index: 2, kind: input, shape index: {}]   ;;  %s5543_s3 = inlined_call_operand.hbm [shape: f32[1,384], index: 3, kind: input, shape index: {}]   ;;  %s5544_s4 = inlined_call_operand.vmem [shape: bf16[128,128], index: 4, kind: input, shape index: {}]   ;;  %s5545_s5 = inlined_call_operand.hbm [shape: f32[1,128], index: 5, kind: input, shape index: {}]   ;;  %s5546_s6 = inlined_call_operand.hbm [shape: f32[1,128], index: 6, kind: input, shape index: {}]   ;;  %s5547_s7 = inlined_call_operand.hbm [shape: f32[1,128], index: 7, kind: input, shape index: {}]   ;;  %s5548_s8 = inlined_call_operand.hbm [shape: bf16[128,256], index: 8, kind: input, shape index: {}]   ;;  %s5549_s9 = inlined_call_operand.hbm [shape: f32[1,256], index: 9, kind: input, shape index: {}]   ;;  %s5550_s10 = inlined_call_operand.hbm [shape: bf16[128,128], index: 10, kind: input, shape index: {}]   ;;  %s5551_s11 = inlined_call_operand.hbm [shape: f32[1,128], index: 11, kind: input, shape index: {}]   ;;  %s5552_s12 = inlined_call_operand.hbm [shape: f32[1,128], index: 12, kind: input, shape index: {}]   ;;  %s5553_s13 = inlined_call_operand.hbm [shape: f32[1,128], index: 13, kind: input, shape index: {}]   ;;  %s5554_s14 = inlined_call_operand.hbm [shape: bf16[128,256], index: 14, kind: input, shape index: {}]   ;;  %s5555_s15 = inlined_call_operand.hbm [shape: f32[1,256], index: 15, kind: input, shape index: {}]   ;;  %s5556_s16 = inlined_call_operand.hbm [shape: bf16[256,128], index: 16, kind: input, shape index: {}]   ;;  %s5557_s17 = inlined_call_operand.hbm [shape: f32[1,128], index: 17, kind: input, shape index: {}]   ;;  %s5558_s18 = inlined_call_operand.hbm [shape: f32[1,128], index: 18, kind: input, shape index: {}]   ;;  %s5559_s19 = inlined_call_operand.hbm [shape: f32[1,128], index: 19, kind: input, shape index: {}]   ;;  %s5560_s20 = inlined_call_operand.hbm [shape: f32[2,8,128], index: 20, kind: output, shape index: {}]  }
   0x1   :  { %5588 = sst [smem:[#allocation52_spill]] %s5540_s0 }
   0x2   :  { %5589 = sst [smem:[#allocation53_spill]] %s5541_s1 }
   0x3   :  { %5590 = sst [smem:[#allocation54_spill]] %s5542_s2 }
   0x4   :  { %5591 = sst [smem:[#allocation55_spill]] %s5543_s3 }
   0x5   :  { %5592 = sst [smem:[#allocation56_spill]] %s5544_s4 }
   0x6   :  { %5593 = sst [smem:[#allocation57_spill]] %s5545_s5 }
   0x7   :  { %5594 = sst [smem:[#allocation58_spill]] %s5546_s6 }
   0x8   :  { %5595 = sst [smem:[#allocation59_spill]] %s5547_s7 }
   0x9   :  { %5596 = sst [smem:[#allocation60_spill]] %s5548_s8 }
   0xa   :  { %5597 = sst [smem:[#allocation61_spill]] %s5549_s9 }
   0xb   :  { %5598 = sst [smem:[#allocation62_spill]] %s5550_s10 }
   0xc   :  { %5599 = sst [smem:[#allocation63_spill]] %s5551_s11 }
   0xd   :  { %5600 = sst [smem:[#allocation64_spill]] %s5552_s12 }
   0xe   :  { %5601 = sst [smem:[#allocation65_spill]] %s5553_s13 }
   0xf   :  { %5602 = sst [smem:[#allocation66_spill]] %s5555_s15 }
  0x10   :  { %5603 = sst [smem:[#allocation67_spill]] %s5557_s17 }
  0x11   :  { %5604 = sst [smem:[#allocation68_spill]] %s5559_s19 }
  0x12   :  { %5605 = sst [smem:[#allocation69_spill]] %s5560_s20 }
  0x13   :  { %25 = vsyncpa [#allocation4], 0 }
  0x14   :  { %27 = vsyncpa [#allocation4 + $0x1], 0 }
  0x15   :  { %28 = vsyncpa [#allocation7], 0 }
  0x16   :  { %30 = vsyncpa [#allocation7 + $0x1], 0 }
  0x17   :  { %31 = vsyncpa [#allocation10], 0 }
  0x18   :  { %32 = vsyncpa [#allocation13], 0 }
  0x19   :  { %33 = vsyncpa [#allocation16], 0 }
  0x1a   :  { %34 = vsyncpa [#allocation19], 0 }
  0x1b   :  { %35 = vsyncpa [#allocation22], 0 }
  0x1c   :  { %36 = vsyncpa [#allocation25], 0 }
  0x1d   :  { %37 = vsyncpa [#allocation28], 0 }
  0x1e   :  { %38 = vsyncpa [#allocation31], 0 }
  0x1f   :  { %39 = vsyncpa [#allocation5], 0 }
  0x20   :  { %41 = vsyncpa [#allocation5 + $0x1], 0  ;;  %s4715_s1 = smov 0   ;;  %s4717_s22 = smov 0  }
  0x21   :  { %s4719_s23 = smov 0   ;;  %s4721_s24 = smov 0  }
  0x22 LB: > { %5606 = sst [smem:[#allocation46_spill]] %s4564_s1  ;;  %s4578_s2 = smov [#allocation8]   ;;  %s4576_s24 = sphi %s4721_s24, %s5103_s24   ;;  %s4572_s23 = sphi %s4719_s23, %s5678_s23   ;;  %s4568_s22 = sphi %s4717_s22, %s5677_s22   ;;  %s4564_s1 = sphi %s4715_s1, %s5676_s1  }
  0x23   : > { %5607 = sst [smem:[#allocation47_spill]] %s4568_s22  ;;  %s520_s25 = sshll.u32 %s4578_s2, 4  ;;  %s4741_s25 = int_to_ptr.vmem [resolvable:$true] %s520_s25 }
  0x24   : > { %5608 = sst [smem:[#allocation48_spill]] %s4572_s23  ;;  %s4736_s3 = sadd.s32 4294967295, %s4576_s24  }
  0x25   : > { %5609 = sst [smem:[#allocation49_spill]] %s4576_s24  ;;  %p3150_p0 = scmp.ge.s32.totalorder %s4576_s24, 1 }
  0x26   : > { %5610 = sst [smem:[#allocation50_spill]] %s4736_s3  ;;  %p5578_p1 = scmp.eq.s32.totalorder %s4736_s3, 0 }
  0x27   : > { %p508_p2 = scmp.lt.s32.totalorder %s4576_s24, 3  ;;  %s4579_s27 = smov [#allocation9]  }
  0x28   : > { %s534_s28 = sshll.u32 %s4579_s27, 4  ;;  %s4580_s29 = smov [#allocation12]   ;;  %s4756_s28 = int_to_ptr.vmem [resolvable:$true] %s534_s28 }
  0x29   : > { %p4743_p3 = pnand %p3150_p0, %p508_p2  ;;  %s559_s30 = sshll.u32 %s4580_s29, 4  ;;  %s4758_s30 = int_to_ptr.vmem [resolvable:$true] %s559_s30 }
  0x2a   : > { %s5614_s2 = sld [smem:[#allocation54_spill]] }
  0x2b   : > { %s5611_s26 = scalar_select %p4743_p3, 1, 0 }
  0x2c   : > { %p3624_p5 = pneg %p4743_p3 }
  0x2d   : > { %5612 = sst [smem:[#allocation51_spill]] %s5611_s26 }
  0x2e   : > { %p4752_p6 = pnand %p3624_p5, %p5578_p1 }
  0x30   : > { %s3934_s20 = scalar_lea.hbm %s5614_s2, 3072  ;;  %p4768_p8 = pneg %p4752_p6 }
  0x31   : > { %p3935_p7 = scmp.ne.s32.totalorder %s5614_s2, %s3934_s20  ;;  %p3941_p11 = scmp.lt.u32.totalorder %s3934_s20, %s5614_s2 }
  0x33   : > { %p3937_p9 = pnand %p4768_p8, %p3935_p7 }
  0x35   : > { %p3938_p10 = pneg %p3937_p9 }
  0x37   : > { %p3943_p12 = pnand %p3941_p11, %p3938_p10 }
  0x39   : > { %3946 = shalt.err (!%p3943_p12)
}
  0x3a   : > { %s3947_s1 = scalar_lea.vmem %s4741_s25, 3072  ;;  %p3955_p5 = scmp.lt.s32.totalorder %s4741_s25, %s4741_s25 }
  0x3b   : > { %p3948_p13 = scmp.ne.s32.totalorder %s4741_s25, %s3947_s1  ;;  %p3956_p4 = scmp.lt.s32.totalorder %s3947_s1, %s3947_s1 }
  0x3d   : > { %p3950_p0 = pnand %p3948_p13, %p4768_p8  ;;  %p3957_p7 = por %p3956_p4, %p3955_p5 }
  0x3f   : > { %p3951_p2 = pneg %p3950_p0 }
  0x41   : > { %p3958_p9 = pnand %p3957_p7, %p3951_p2 }
  0x43   : > { %3961 = shalt.err (!%p3958_p9)
}
  0x44   : > { %s4581_s26 = smov 192   ;;  %s4582_s20 = smov 12  }
  0x45   : > { %3627 = dma.hbm_to_vmem [thread:$0]  (!%p4752_p6), %s5614_s2, 3072, %s4741_s25, [#allocation7], %s4581_s26, %s4581_s26, %s4582_s20  }
  0x46   : > { %s5616_s22 = sld [smem:[#allocation55_spill]] }
  0x4c   : > { %s5617_s19 = smov %s5616_s22  ;;  %s3962_s23 = scalar_lea.hbm %s5616_s22, 48 }
  0x4d   : > { %p3963_p4 = scmp.ne.s32.totalorder %s5617_s19, %s3962_s23  ;;  %p3969_p12 = scmp.lt.u32.totalorder %s3962_s23, %s5617_s19 }
  0x4f   : > { %p3965_p10 = pnand %p3963_p4, %p4768_p8 }
  0x51   : > { %p3966_p11 = pneg %p3965_p10 }
  0x53   : > { %p3971_p13 = pnand %p3969_p12, %p3966_p11 }
  0x55   : > { %3974 = shalt.err (!%p3971_p13)
}
  0x56   : > { %s3975_s25 = scalar_lea.vmem %s4756_s28, 48  ;;  %s3982_s17 = scalar_lea.vmem %s4756_s28, 64 }
  0x57   : > { %p3976_p0 = scmp.ne.s32.totalorder %s4756_s28, %s3975_s25  ;;  %p3983_p7 = scmp.lt.s32.totalorder %s4756_s28, %s4756_s28 }
  0x58   : > { %p3984_p9 = scmp.lt.s32.totalorder %s3982_s17, %s3975_s25 }
  0x59   : > { %p3978_p2 = pnand %p3976_p0, %p4768_p8 }
  0x5a   : > { %p3985_p4 = por %p3984_p9, %p3983_p7 }
  0x5b   : > { %p3979_p5 = pneg %p3978_p2 }
  0x5d   : > { %p3986_p10 = pnand %p3985_p4, %p3979_p5 }
  0x5f   : > { %3989 = shalt.err (!%p3986_p10)
}
  0x60   : > { %3630 = dma.hbm_to_vmem [thread:$0]  (!%p4752_p6), %s5617_s19, 48, %s4756_s28, [#allocation10]  }
  0x61   : > { %s5618_s6 = sld [smem:[#allocation58_spill]] }
  0x67   : > { %s3990_s26 = scalar_lea.hbm %s5618_s6, 16 }
  0x68   : > { %p3991_p11 = scmp.ne.s32.totalorder %s5618_s6, %s3990_s26  ;;  %p3997_p0 = scmp.lt.u32.totalorder %s3990_s26, %s5618_s6 }
  0x6a   : > { %p3993_p12 = pnand %p3991_p11, %p4768_p8 }
  0x6c   : > { %p3994_p13 = pneg %p3993_p12 }
  0x6e   : > { %p3999_p2 = pnand %p3997_p0, %p3994_p13 }
  0x70   : > { %4002 = shalt.err (!%p3999_p2)
}
  0x71   : > { %s4003_s28 = scalar_lea.vmem %s4758_s30, 16  ;;  %s4010_s29 = scalar_lea.vmem %s4758_s30, 32 }
  0x72   : > { %p4004_p5 = scmp.ne.s32.totalorder %s4758_s30, %s4003_s28  ;;  %p4011_p4 = scmp.lt.s32.totalorder %s4758_s30, %s4758_s30 }
  0x73   : > { %p4012_p10 = scmp.lt.s32.totalorder %s4010_s29, %s4003_s28 }
  0x74   : > { %p4006_p7 = pnand %p4004_p5, %p4768_p8 }
  0x75   : > { %p4013_p11 = por %p4012_p10, %p4011_p4 }
  0x76   : > { %p4007_p9 = pneg %p4006_p7 }
  0x78   : > { %p4014_p12 = pnand %p4013_p11, %p4007_p9 }
  0x7a   : > { %4017 = shalt.err (!%p4014_p12)
}
  0x7b   : > { %3636 = dma.hbm_to_vmem [thread:$0]  (!%p4752_p6), %s5618_s6, 16, %s4758_s30, [#allocation13]  }
  0x7c   : > { %s4583_s17 = smov [#allocation15]   ;;  %s5619_s8 = sld [smem:[#allocation60_spill]] }
  0x7d   : > { %s580_s15 = sshll.u32 %s4583_s17, 4  ;;  %s581_s15 = int_to_ptr.vmem [resolvable:$true] %s580_s15 }
  0x82   : > { %s4018_s24 = scalar_lea.hbm %s5619_s8, 2048 }
  0x83   : > { %p4019_p13 = scmp.ne.s32.totalorder %s5619_s8, %s4018_s24  ;;  %p4025_p5 = scmp.lt.u32.totalorder %s4018_s24, %s5619_s8 }
  0x85   : > { %p4021_p0 = pnand %p4019_p13, %p4768_p8 }
  0x87   : > { %p4022_p2 = pneg %p4021_p0 }
  0x89   : > { %p4027_p7 = pnand %p4025_p5, %p4022_p2 }
  0x8b   : > { %4030 = shalt.err (!%p4027_p7)
}
  0x8c   : > { %s4031_s30 = scalar_lea.vmem %s581_s15, 2048  ;;  %p4039_p11 = scmp.lt.s32.totalorder %s581_s15, %s581_s15 }
  0x8d   : > { %p4032_p9 = scmp.ne.s32.totalorder %s581_s15, %s4031_s30  ;;  %p4040_p12 = scmp.lt.s32.totalorder %s4031_s30, %s4031_s30 }
  0x8f   : > { %p4034_p4 = pnand %p4032_p9, %p4768_p8  ;;  %p4041_p1 = por %p4040_p12, %p4039_p11 }
  0x91   : > { %p4035_p10 = pneg %p4034_p4 }
  0x93   : > { %p4042_p3 = pnand %p4041_p1, %p4035_p10 }
  0x95   : > { %4045 = shalt.err (!%p4042_p3)
}
  0x96   : > { %s5580_s21 = smov 128   ;;  %s5582_s28 = smov 8  }
  0x97   : > { %3642 = dma.hbm_to_vmem [thread:$0]  (!%p4752_p6), %s5619_s8, 2048, %s581_s15, [#allocation16], %s5580_s21, %s5580_s21, %s5582_s28  }
  0x98   : > { %s4586_s25 = smov [#allocation18]   ;;  %s5620_s10 = sld [smem:[#allocation62_spill]] }
  0x99   : > { %s604_s17 = sshll.u32 %s4586_s25, 4  ;;  %s605_s17 = int_to_ptr.vmem [resolvable:$true] %s604_s17 }
  0x9e   : > { %s4046_s24 = scalar_lea.hbm %s5620_s10, 1024 }
  0x9f   : > { %p4047_p1 = scmp.ne.s32.totalorder %s5620_s10, %s4046_s24  ;;  %p4053_p0 = scmp.lt.u32.totalorder %s4046_s24, %s5620_s10 }
  0xa1   : > { %p4049_p3 = pnand %p4047_p1, %p4768_p8 }
  0xa3   : > { %p4050_p13 = pneg %p4049_p3 }
  0xa5   : > { %p4055_p2 = pnand %p4053_p0, %p4050_p13 }
  0xa7   : > { %4058 = shalt.err (!%p4055_p2)
}
  0xa8   : > { %s4059_s15 = scalar_lea.vmem %s605_s17, 1024  ;;  %p4067_p4 = scmp.lt.s32.totalorder %s605_s17, %s605_s17 }
  0xa9   : > { %p4060_p5 = scmp.ne.s32.totalorder %s605_s17, %s4059_s15  ;;  %p4068_p10 = scmp.lt.s32.totalorder %s4059_s15, %s4059_s15 }
  0xab   : > { %p4062_p7 = pnand %p4060_p5, %p4768_p8  ;;  %p4069_p11 = por %p4068_p10, %p4067_p4 }
  0xad   : > { %p4063_p9 = pneg %p4062_p7 }
  0xaf   : > { %p4070_p12 = pnand %p4069_p11, %p4063_p9 }
  0xb1   : > { %4073 = shalt.err (!%p4070_p12)
}
  0xb2   : > { %s5585_s30 = smov 64   ;;  %s4588_s29 = smov 4  }
  0xb3   : > { %3648 = dma.hbm_to_vmem [thread:$0]  (!%p4752_p6), %s5620_s10, 1024, %s605_s17, [#allocation19], %s5585_s30, %s5585_s30, %s4588_s29  }
  0xb4   : > { %s4589_s22 = smov [#allocation21]   ;;  %s4590_s24 = smov [#allocation24]  }
  0xb5   : > { %s629_s23 = sshll.u32 %s4589_s22, 4  ;;  %s650_s26 = sshll.u32 %s4590_s24, 4  ;;  %s630_s23 = int_to_ptr.vmem [resolvable:$true] %s629_s23  ;;  %s651_s26 = int_to_ptr.vmem [resolvable:$true] %s650_s26 }
  0xb6   : > { %s5621_s12 = sld [smem:[#allocation64_spill]] }
  0xbc   : > { %s4074_s0 = scalar_lea.hbm %s5621_s12, 16 }
  0xbd   : > { %p4075_p1 = scmp.ne.s32.totalorder %s5621_s12, %s4074_s0  ;;  %p4081_p0 = scmp.lt.u32.totalorder %s4074_s0, %s5621_s12 }
  0xbf   : > { %p4077_p3 = pnand %p4075_p1, %p4768_p8 }
  0xc1   : > { %p4078_p13 = pneg %p4077_p3 }
  0xc3   : > { %p4083_p2 = pnand %p4081_p0, %p4078_p13 }
  0xc5   : > { %4086 = shalt.err (!%p4083_p2)
}
  0xc6   : > { %s4087_s17 = scalar_lea.vmem %s630_s23, 16  ;;  %s4094_s1 = scalar_lea.vmem %s630_s23, 32 }
  0xc7   : > { %p4088_p5 = scmp.ne.s32.totalorder %s630_s23, %s4087_s17  ;;  %p4095_p4 = scmp.lt.s32.totalorder %s630_s23, %s630_s23 }
  0xc8   : > { %p4096_p10 = scmp.lt.s32.totalorder %s4094_s1, %s4087_s17 }
  0xc9   : > { %p4090_p7 = pnand %p4088_p5, %p4768_p8 }
  0xca   : > { %p4097_p11 = por %p4096_p10, %p4095_p4 }
  0xcb   : > { %p4091_p9 = pneg %p4090_p7 }
  0xcd   : > { %p4098_p12 = pnand %p4097_p11, %p4091_p9 }
  0xcf   : > { %4101 = shalt.err (!%p4098_p12)
}
  0xd0   : > { %3654 = dma.hbm_to_vmem [thread:$0]  (!%p4752_p6), %s5621_s12, 16, %s630_s23, [#allocation22]  }
  0xd1   : > { %s4102_s22 = scalar_lea.hbm %s5554_s14, 2048 }
  0xd2   : > { %p4103_p1 = scmp.ne.s32.totalorder %s5554_s14, %s4102_s22  ;;  %p4109_p0 = scmp.lt.u32.totalorder %s4102_s22, %s5554_s14 }
  0xd4   : > { %p4105_p3 = pnand %p4103_p1, %p4768_p8 }
  0xd6   : > { %p4106_p13 = pneg %p4105_p3 }
  0xd8   : > { %p4111_p2 = pnand %p4109_p0, %p4106_p13 }
  0xda   : > { %4114 = shalt.err (!%p4111_p2)
}
  0xdb   : > { %s4115_s15 = scalar_lea.vmem %s651_s26, 2048  ;;  %p4123_p4 = scmp.lt.s32.totalorder %s651_s26, %s651_s26 }
  0xdc   : > { %p4116_p5 = scmp.ne.s32.totalorder %s651_s26, %s4115_s15  ;;  %p4124_p10 = scmp.lt.s32.totalorder %s4115_s15, %s4115_s15 }
  0xde   : > { %p4118_p7 = pnand %p4116_p5, %p4768_p8  ;;  %p4125_p11 = por %p4124_p10, %p4123_p4 }
  0xe0   : > { %p4119_p9 = pneg %p4118_p7 }
  0xe2   : > { %p4126_p12 = pnand %p4125_p11, %p4119_p9 }
  0xe4   : > { %4129 = shalt.err (!%p4126_p12)
}
  0xe5   : > { %s5622_s23 = smov 8   ;;  %s5623_s17 = smov 128  }
  0xe6   : > { %3660 = dma.hbm_to_vmem [thread:$0]  (!%p4752_p6), %s5554_s14, 2048, %s651_s26, [#allocation25], %s5623_s17, %s5623_s17, %s5622_s23  }
  0xe7   : > { %s4591_s25 = smov [#allocation27]   ;;  %s4592_s28 = smov [#allocation30]  }
  0xe8   : > { %s674_s2 = sshll.u32 %s4591_s25, 4  ;;  %s699_s22 = sshll.u32 %s4592_s28, 4  ;;  %s675_s2 = int_to_ptr.vmem [resolvable:$true] %s674_s2  ;;  %s700_s22 = int_to_ptr.vmem [resolvable:$true] %s699_s22 }
  0xe9   : > { %s4130_s3 = scalar_lea.hbm %s5556_s16, 2048 }
  0xea   : > { %p4131_p1 = scmp.ne.s32.totalorder %s5556_s16, %s4130_s3  ;;  %p4137_p0 = scmp.lt.u32.totalorder %s4130_s3, %s5556_s16 }
  0xec   : > { %p4133_p3 = pnand %p4131_p1, %p4768_p8 }
  0xee   : > { %p4134_p13 = pneg %p4133_p3 }
  0xf0   : > { %p4139_p2 = pnand %p4137_p0, %p4134_p13 }
  0xf2   : > { %4142 = shalt.err (!%p4139_p2)
}
  0xf3   : > { %s4143_s26 = scalar_lea.vmem %s675_s2, 2048  ;;  %p4151_p4 = scmp.lt.s32.totalorder %s675_s2, %s675_s2 }
  0xf4   : > { %p4144_p5 = scmp.ne.s32.totalorder %s675_s2, %s4143_s26  ;;  %p4152_p10 = scmp.lt.s32.totalorder %s4143_s26, %s4143_s26 }
  0xf6   : > { %p4146_p7 = pnand %p4144_p5, %p4768_p8  ;;  %p4153_p11 = por %p4152_p10, %p4151_p4 }
  0xf8   : > { %p4147_p9 = pneg %p4146_p7 }
  0xfa   : > { %p4154_p12 = pnand %p4153_p11, %p4147_p9 }
  0xfc   : > { %4157 = shalt.err (!%p4154_p12)
}
  0xfd   : > { %s5624_s21 = smov 64   ;;  %s4158_s20 = scalar_lea.hbm %s5558_s18, 16 }
  0xfe   : > { %3666 = dma.hbm_to_vmem [thread:$0]  (!%p4752_p6), %s5556_s16, 2048, %s675_s2, [#allocation28], %s5624_s21, %s5624_s21, %s4588_s29  }
  0xff   : > { %p4159_p1 = scmp.ne.s32.totalorder %s5558_s18, %s4158_s20  ;;  %p4165_p0 = scmp.lt.u32.totalorder %s4158_s20, %s5558_s18 }
 0x101   : > { %p4161_p3 = pnand %p4159_p1, %p4768_p8 }
 0x103   : > { %p4162_p13 = pneg %p4161_p3 }
 0x105   : > { %p4167_p2 = pnand %p4165_p0, %p4162_p13 }
 0x107   : > { %4170 = shalt.err (!%p4167_p2)
}
 0x108   : > { %s4171_s26 = scalar_lea.vmem %s700_s22, 16  ;;  %s4178_s29 = scalar_lea.vmem %s700_s22, 32 }
 0x109   : > { %p4172_p5 = scmp.ne.s32.totalorder %s700_s22, %s4171_s26  ;;  %p4179_p4 = scmp.lt.s32.totalorder %s700_s22, %s700_s22 }
 0x10a   : > { %p4180_p10 = scmp.lt.s32.totalorder %s4178_s29, %s4171_s26 }
 0x10b   : > { %p4174_p7 = pnand %p4172_p5, %p4768_p8 }
 0x10c   : > { %p4181_p11 = por %p4180_p10, %p4179_p4 }
 0x10d   : > { %p4175_p9 = pneg %p4174_p7 }
 0x10f   : > { %p4182_p12 = pnand %p4181_p11, %p4175_p9 }
 0x111   : > { %4185 = shalt.err (!%p4182_p12)
}
 0x112   : > { %3672 = dma.hbm_to_vmem [thread:$0]  (!%p4752_p6), %s5558_s18, 16, %s700_s22, [#allocation31]  }
 0x113   : > { %s4593_s30 = smov [#allocation11]   ;;  %s4594_s28 = smov [#allocation14]  }
 0x114   : > { %s548_s25 = sshll.u32 %s4593_s30, 4  ;;  %s570_s24 = sshll.u32 %s4594_s28, 4  ;;  %s549_s25 = int_to_ptr.vmem [resolvable:$true] %s548_s25  ;;  %s571_s24 = int_to_ptr.vmem [resolvable:$true] %s570_s24 }
 0x115   : > { %s5625_s5 = sld [smem:[#allocation57_spill]] }
 0x11b   : > { %s4186_s0 = scalar_lea.hbm %s5625_s5, 16 }
 0x11c   : > { %p4187_p1 = scmp.ne.s32.totalorder %s5625_s5, %s4186_s0  ;;  %p4193_p0 = scmp.lt.u32.totalorder %s4186_s0, %s5625_s5 }
 0x11e   : > { %p4189_p3 = pnand %p4187_p1, %p4768_p8 }
 0x120   : > { %p4190_p13 = pneg %p4189_p3 }
 0x122   : > { %p4195_p2 = pnand %p4193_p0, %p4190_p13 }
 0x124   : > { %4198 = shalt.err (!%p4195_p2)
}
 0x125   : > { %s4199_s22 = scalar_lea.vmem %s549_s25, 16  ;;  %s4206_s2 = scalar_lea.vmem %s549_s25, 32 }
 0x126   : > { %p4200_p5 = scmp.ne.s32.totalorder %s549_s25, %s4199_s22  ;;  %p4207_p4 = scmp.lt.s32.totalorder %s549_s25, %s549_s25 }
 0x127   : > { %p4208_p10 = scmp.lt.s32.totalorder %s4206_s2, %s4199_s22 }
 0x128   : > { %p4202_p7 = pnand %p4200_p5, %p4768_p8 }
 0x129   : > { %p4209_p11 = por %p4208_p10, %p4207_p4 }
 0x12a   : > { %p4203_p9 = pneg %p4202_p7 }
 0x12c   : > { %p4210_p12 = pnand %p4209_p11, %p4203_p9 }
 0x12e   : > { %4213 = shalt.err (!%p4210_p12)
}
 0x12f   : > { %3633 = dma.hbm_to_vmem [thread:$0]  (!%p4752_p6), %s5625_s5, 16, %s549_s25, [#allocation10]  }
 0x130   : > { %s5626_s7 = sld [smem:[#allocation59_spill]] }
 0x136   : > { %s4214_s3 = scalar_lea.hbm %s5626_s7, 16 }
 0x137   : > { %p4215_p1 = scmp.ne.s32.totalorder %s5626_s7, %s4214_s3  ;;  %p4221_p0 = scmp.lt.u32.totalorder %s4214_s3, %s5626_s7 }
 0x139   : > { %p4217_p3 = pnand %p4215_p1, %p4768_p8 }
 0x13b   : > { %p4218_p13 = pneg %p4217_p3 }
 0x13d   : > { %p4223_p2 = pnand %p4221_p0, %p4218_p13 }
 0x13f   : > { %4226 = shalt.err (!%p4223_p2)
}
 0x140   : > { %s4227_s29 = scalar_lea.vmem %s571_s24, 16  ;;  %s4234_s25 = scalar_lea.vmem %s571_s24, 32 }
 0x141   : > { %p4228_p5 = scmp.ne.s32.totalorder %s571_s24, %s4227_s29  ;;  %p4235_p4 = scmp.lt.s32.totalorder %s571_s24, %s571_s24 }
 0x142   : > { %p4236_p10 = scmp.lt.s32.totalorder %s4234_s25, %s4227_s29 }
 0x143   : > { %p4230_p7 = pnand %p4228_p5, %p4768_p8 }
 0x144   : > { %p4237_p11 = por %p4236_p10, %p4235_p4 }
 0x145   : > { %p4231_p9 = pneg %p4230_p7 }
 0x147   : > { %p4238_p12 = pnand %p4237_p11, %p4231_p9 }
 0x149   : > { %4241 = shalt.err (!%p4238_p12)
}
 0x14a   : > { %3639 = dma.hbm_to_vmem [thread:$0]  (!%p4752_p6), %s5626_s7, 16, %s571_s24, [#allocation13]  }
 0x14b   : > { %s4595_s21 = smov [#allocation17]   ;;  %s4596_s28 = smov [#allocation20]  }
 0x14c   : > { %s594_s30 = sshll.u32 %s4595_s21, 4  ;;  %s618_s20 = sshll.u32 %s4596_s28, 4  ;;  %s595_s30 = int_to_ptr.vmem [resolvable:$true] %s594_s30  ;;  %s619_s20 = int_to_ptr.vmem [resolvable:$true] %s618_s20 }
 0x14d   : > { %s5627_s9 = sld [smem:[#allocation61_spill]] }
 0x153   : > { %s4242_s15 = scalar_lea.hbm %s5627_s9, 32 }
 0x154   : > { %p4243_p1 = scmp.ne.s32.totalorder %s5627_s9, %s4242_s15  ;;  %p4249_p0 = scmp.lt.u32.totalorder %s4242_s15, %s5627_s9 }
 0x156   : > { %p4245_p3 = pnand %p4243_p1, %p4768_p8 }
 0x158   : > { %p4246_p13 = pneg %p4245_p3 }
 0x15a   : > { %p4251_p2 = pnand %p4249_p0, %p4246_p13 }
 0x15c   : > { %4254 = shalt.err (!%p4251_p2)
}
 0x15d   : > { %s4255_s24 = scalar_lea.vmem %s595_s30, 32  ;;  %p4263_p4 = scmp.lt.s32.totalorder %s595_s30, %s595_s30 }
 0x15e   : > { %p4256_p5 = scmp.ne.s32.totalorder %s595_s30, %s4255_s24  ;;  %p4264_p10 = scmp.lt.s32.totalorder %s4255_s24, %s4255_s24 }
 0x160   : > { %p4258_p7 = pnand %p4256_p5, %p4768_p8  ;;  %p4265_p11 = por %p4264_p10, %p4263_p4 }
 0x162   : > { %p4259_p9 = pneg %p4258_p7 }
 0x164   : > { %p4266_p12 = pnand %p4265_p11, %p4259_p9 }
 0x166   : > { %4269 = shalt.err (!%p4266_p12)
}
 0x167   : > { %3645 = dma.hbm_to_vmem [thread:$0]  (!%p4752_p6), %s5627_s9, 32, %s595_s30, [#allocation16]  }
 0x168   : > { %s5628_s11 = sld [smem:[#allocation63_spill]] }
 0x16e   : > { %s4270_s3 = scalar_lea.hbm %s5628_s11, 16 }
 0x16f   : > { %p4271_p1 = scmp.ne.s32.totalorder %s5628_s11, %s4270_s3  ;;  %p4277_p0 = scmp.lt.u32.totalorder %s4270_s3, %s5628_s11 }
 0x171   : > { %p4273_p3 = pnand %p4271_p1, %p4768_p8 }
 0x173   : > { %p4274_p13 = pneg %p4273_p3 }
 0x175   : > { %p4279_p2 = pnand %p4277_p0, %p4274_p13 }
 0x177   : > { %4282 = shalt.err (!%p4279_p2)
}
 0x178   : > { %s4283_s29 = scalar_lea.vmem %s619_s20, 16  ;;  %s4290_s30 = scalar_lea.vmem %s619_s20, 32 }
 0x179   : > { %p4284_p5 = scmp.ne.s32.totalorder %s619_s20, %s4283_s29  ;;  %p4291_p4 = scmp.lt.s32.totalorder %s619_s20, %s619_s20 }
 0x17a   : > { %p4292_p10 = scmp.lt.s32.totalorder %s4290_s30, %s4283_s29 }
 0x17b   : > { %p4286_p7 = pnand %p4284_p5, %p4768_p8 }
 0x17c   : > { %p4293_p11 = por %p4292_p10, %p4291_p4 }
 0x17d   : > { %p4287_p9 = pneg %p4286_p7 }
 0x17f   : > { %p4294_p12 = pnand %p4293_p11, %p4287_p9 }
 0x181   : > { %4297 = shalt.err (!%p4294_p12)
}
 0x182   : > { %3651 = dma.hbm_to_vmem [thread:$0]  (!%p4752_p6), %s5628_s11, 16, %s619_s20, [#allocation19]  }
 0x183   : > { %s4597_s22 = smov [#allocation23]   ;;  %s4598_s21 = smov [#allocation26]  }
 0x184   : > { %s640_s2 = sshll.u32 %s4597_s22, 4  ;;  %s664_s28 = sshll.u32 %s4598_s21, 4  ;;  %s641_s2 = int_to_ptr.vmem [resolvable:$true] %s640_s2  ;;  %s665_s28 = int_to_ptr.vmem [resolvable:$true] %s664_s28 }
 0x185   : > { %s5629_s13 = sld [smem:[#allocation65_spill]] }
 0x18b   : > { %s4298_s15 = scalar_lea.hbm %s5629_s13, 16 }
 0x18c   : > { %p4299_p1 = scmp.ne.s32.totalorder %s5629_s13, %s4298_s15  ;;  %p4305_p0 = scmp.lt.u32.totalorder %s4298_s15, %s5629_s13 }
 0x18e   : > { %p4301_p3 = pnand %p4299_p1, %p4768_p8 }
 0x190   : > { %p4302_p13 = pneg %p4301_p3 }
 0x192   : > { %p4307_p2 = pnand %p4305_p0, %p4302_p13 }
 0x194   : > { %4310 = shalt.err (!%p4307_p2)
}
 0x195   : > { %s4311_s20 = scalar_lea.vmem %s641_s2, 16  ;;  %s4318_s25 = scalar_lea.vmem %s641_s2, 32 }
 0x196   : > { %p4312_p5 = scmp.ne.s32.totalorder %s641_s2, %s4311_s20  ;;  %p4319_p4 = scmp.lt.s32.totalorder %s641_s2, %s641_s2 }
 0x197   : > { %p4320_p10 = scmp.lt.s32.totalorder %s4318_s25, %s4311_s20 }
 0x198   : > { %p4314_p7 = pnand %p4312_p5, %p4768_p8 }
 0x199   : > { %p4321_p11 = por %p4320_p10, %p4319_p4 }
 0x19a   : > { %p4315_p9 = pneg %p4314_p7 }
 0x19c   : > { %p4322_p12 = pnand %p4321_p11, %p4315_p9 }
 0x19e   : > { %4325 = shalt.err (!%p4322_p12)
}
 0x19f   : > { %3657 = dma.hbm_to_vmem [thread:$0]  (!%p4752_p6), %s5629_s13, 16, %s641_s2, [#allocation22]  }
 0x1a0   : > { %s5630_s0 = sld [smem:[#allocation66_spill]] }
 0x1a6   : > { %s4326_s15 = scalar_lea.hbm %s5630_s0, 32 }
 0x1a7   : > { %p4327_p1 = scmp.ne.s32.totalorder %s5630_s0, %s4326_s15  ;;  %p4333_p0 = scmp.lt.u32.totalorder %s4326_s15, %s5630_s0 }
 0x1a9   : > { %p4329_p3 = pnand %p4327_p1, %p4768_p8 }
 0x1ab   : > { %p4330_p13 = pneg %p4329_p3 }
 0x1ad   : > { %p4335_p2 = pnand %p4333_p0, %p4330_p13 }
 0x1af   : > { %4338 = shalt.err (!%p4335_p2)
}
 0x1b0   : > { %s4339_s20 = scalar_lea.vmem %s665_s28, 32  ;;  %p4347_p4 = scmp.lt.s32.totalorder %s665_s28, %s665_s28 }
 0x1b1   : > { %p4340_p5 = scmp.ne.s32.totalorder %s665_s28, %s4339_s20  ;;  %p4348_p10 = scmp.lt.s32.totalorder %s4339_s20, %s4339_s20 }
 0x1b3   : > { %p4342_p7 = pnand %p4340_p5, %p4768_p8  ;;  %p4349_p11 = por %p4348_p10, %p4347_p4 }
 0x1b5   : > { %p4343_p9 = pneg %p4342_p7 }
 0x1b7   : > { %p4350_p12 = pnand %p4349_p11, %p4343_p9 }
 0x1b9   : > { %4353 = shalt.err (!%p4350_p12)
}
 0x1ba   : > { %3663 = dma.hbm_to_vmem [thread:$0]  (!%p4752_p6), %s5630_s0, 32, %s665_s28, [#allocation25]  }
 0x1bb   : > { %s4599_s24 = smov [#allocation29]   ;;  %s4600_s21 = smov [#allocation32]  }
 0x1bc   : > { %s688_s22 = sshll.u32 %s4599_s24, 4  ;;  %s710_s3 = sshll.u32 %s4600_s21, 4  ;;  %s689_s22 = int_to_ptr.vmem [resolvable:$true] %s688_s22  ;;  %s711_s3 = int_to_ptr.vmem [resolvable:$true] %s710_s3 }
 0x1bd   : > { %s5631_s26 = sld [smem:[#allocation67_spill]] }
 0x1c3   : > { %s4354_s29 = scalar_lea.hbm %s5631_s26, 16 }
 0x1c4   : > { %p4355_p1 = scmp.ne.s32.totalorder %s5631_s26, %s4354_s29  ;;  %p4361_p0 = scmp.lt.u32.totalorder %s4354_s29, %s5631_s26 }
 0x1c6   : > { %p4357_p3 = pnand %p4355_p1, %p4768_p8 }
 0x1c8   : > { %p4358_p13 = pneg %p4357_p3 }
 0x1ca   : > { %p4363_p2 = pnand %p4361_p0, %p4358_p13 }
 0x1cc   : > { %4366 = shalt.err (!%p4363_p2)
}
 0x1cd   : > { %s4367_s28 = scalar_lea.vmem %s689_s22, 16  ;;  %s4374_s25 = scalar_lea.vmem %s689_s22, 32 }
 0x1ce   : > { %p4368_p5 = scmp.ne.s32.totalorder %s689_s22, %s4367_s28  ;;  %p4375_p4 = scmp.lt.s32.totalorder %s689_s22, %s689_s22 }
 0x1cf   : > { %p4376_p10 = scmp.lt.s32.totalorder %s4374_s25, %s4367_s28 }
 0x1d0   : > { %p4370_p7 = pnand %p4368_p5, %p4768_p8 }
 0x1d1   : > { %p4377_p11 = por %p4376_p10, %p4375_p4 }
 0x1d2   : > { %p4371_p9 = pneg %p4370_p7 }
 0x1d4   : > { %p4378_p12 = pnand %p4377_p11, %p4371_p9 }
 0x1d6   : > { %4381 = shalt.err (!%p4378_p12)
}
 0x1d7   : > { %3669 = dma.hbm_to_vmem [thread:$0]  (!%p4752_p6), %s5631_s26, 16, %s689_s22, [#allocation28]  }
 0x1d8   : > { %s5632_s1 = sld [smem:[#allocation68_spill]] }
 0x1de   : > { %s5633_s29 = smov %s5632_s1  ;;  %s4382_s30 = scalar_lea.hbm %s5632_s1, 16 }
 0x1df   : > { %p4383_p1 = scmp.ne.s32.totalorder %s5633_s29, %s4382_s30  ;;  %p4389_p0 = scmp.lt.u32.totalorder %s4382_s30, %s5633_s29 }
 0x1e1   : > { %p4385_p3 = pnand %p4383_p1, %p4768_p8 }
 0x1e3   : > { %p4386_p13 = pneg %p4385_p3 }
 0x1e5   : > { %p4391_p2 = pnand %p4389_p0, %p4386_p13 }
 0x1e7   : > { %4394 = shalt.err (!%p4391_p2)
}
 0x1e8   : > { %s4395_s24 = scalar_lea.vmem %s711_s3, 16  ;;  %s4402_s22 = scalar_lea.vmem %s711_s3, 32 }
 0x1e9   : > { %p4396_p5 = scmp.ne.s32.totalorder %s711_s3, %s4395_s24  ;;  %p4403_p4 = scmp.lt.s32.totalorder %s711_s3, %s711_s3 }
 0x1ea   : > { %p4404_p10 = scmp.lt.s32.totalorder %s4402_s22, %s4395_s24 }
 0x1eb   : > { %p4398_p7 = pnand %p4396_p5, %p4768_p8 }
 0x1ec   : > { %p4405_p11 = por %p4404_p10, %p4403_p4 }
 0x1ed   : > { %p4399_p9 = pneg %p4398_p7 }
 0x1ef   : > { %p4406_p12 = pnand %p4405_p11, %p4399_p9 }
 0x1f1   : > { %4409 = shalt.err (!%p4406_p12)
}
 0x1f2   : > { %s5634_s15 = sld [smem:[#allocation49_spill]]  ;;  %s5635_s1 = sld [smem:[#allocation48_spill]] }
 0x1f3   : > { %s5636_s30 = sld [smem:[#allocation47_spill]]  ;;  %s5637_s27 = sld [smem:[#allocation46_spill]] }
 0x1f4   : > { %s5638_s20 = sld [smem:[#allocation50_spill]] }
 0x1f5   : > { %3675 = dma.hbm_to_vmem [thread:$0]  (!%p4752_p6), %s5633_s29, 16, %s711_s3, [#allocation31]  }
 0x1f8   : > { %s3149_s2 = sadd.s32 4294967294, %s5634_s15   ;;  %s5103_s24 = sadd.s32 1, %s5634_s15  }
 0x1f9   : > { %s54_s4 = sadd.s32 1, %s5635_s1  ;;  %s51_s28 = ssub.s32 %s5634_s15, %s5103_s24 }
 0x1fa   : > { %p61_p8 = scmp.ne.s32.totalorder %s5635_s1, %s5636_s30  ;;  %p52_p1 = scmp.eq.s32.totalorder %s51_s28, 0 }
 0x1fb   : > { %p62_p3 = scmp.eq.s32.totalorder %s5634_s15, 0  ;;  %p67_p13 = scmp.ne.s32.totalorder %s5636_s30, %s5637_s27 }
 0x1fc   : > { %p495_p0 = scmp.eq.s32.totalorder %s5638_s20, 1  ;;  %p5639_p5 = scmp.eq.s32.totalorder %s5638_s20, 0 }
 0x1fd   : > { %s5115_s25 = scalar_select %p52_p1, %s5635_s1, %s54_s4  }
 0x1fe   : > { %p63_p2 = por %p62_p3, %p61_p8  ;;  %p5119_p7 = por %p5639_p5, %p67_p13 }
 0x1ff   : > { %p5123_p6 = por %p495_p0, %p61_p8  ;;  %p501_p9 = scmp.eq.s32.totalorder %s3149_s2, 1 }
 0x200   : > { %p3704_p4 = scmp.lt.s32.totalorder %s5634_s15, 2  ;;  %s5129_s21 = sand.u32 1, %s5635_s1  }
 0x201   : > { %s5641_s3 = scalar_select %p5123_p6, 1, 0 }
 0x202   : > { %p5131_p10 = por %p501_p9, %p67_p13  ;;  %s3169_s30 = sshll.u32 %s5129_s21, 3 }
 0x203   : > { %s3170_s27 = sshll.u32 %s5634_s15, 7  ;;  %s5643_s28 = sld [smem:[#allocation52_spill]] }
 0x204   : > { %s5642_s5 = scalar_select %p5131_p10, 1, 0 }
 0x205   : > { %s725_s1 = scalar_lea.vmem [#allocation3], %s3169_s30  ;;  %p5142_p11 = pnand %p3704_p4, %p63_p2 }
 0x206   : > { %s732_s2 = sshll.u32 %s725_s1, 4  ;;  %s722_s8 = scalar_lea.sflag [#allocation4], %s5129_s21  ;;  %s5146_s2 = int_to_ptr.vmem [resolvable:$true] %s732_s2 }
 0x207   : > { %p4412_p8 = pneg %p5142_p11 }
 0x209   : > { %s5140_s0 = scalar_lea.hbm %s5643_s28, %s3170_s27  ;;  %s4415_s20 = scalar_lea.hbm %s5643_s28, 256 }
 0x20a   : > { %s4410_s9 = scalar_lea.hbm %s5140_s0, 128  ;;  %p4416_p13 = scmp.lt.u32.totalorder %s5140_s0, %s5643_s28 }
 0x20b   : > { %p4411_p12 = scmp.ne.s32.totalorder %s5140_s0, %s4410_s9  ;;  %p4417_p0 = scmp.lt.u32.totalorder %s4415_s20, %s4410_s9 }
 0x20c   : > { %p4419_p5 = scmp.lt.u32.totalorder %s4410_s9, %s5140_s0 }
 0x20d   : > { %p4413_p1 = pnand %p4412_p8, %p4411_p12  ;;  %p4418_p2 = por %p4417_p0, %p4416_p13 }
 0x20f   : > { %p4414_p3 = pneg %p4413_p1  ;;  %p4420_p9 = por %p4419_p5, %p4418_p2 }
 0x211   : > { %p4421_p4 = pnand %p4420_p9, %p4414_p3 }
 0x213   : > { %4424 = shalt.err (!%p4421_p4)
}
 0x214   : > { %s4425_s7 = scalar_lea.vmem %s5146_s2, 128  ;;  %s4601_s30 = smov [#allocation3]  }
 0x215   : > { %p4426_p12 = scmp.ne.s32.totalorder %s5146_s2, %s4425_s7  ;;  %s4430_s27 = sshll.u32 %s4601_s30, 4  ;;  %s4431_s27 = int_to_ptr.vmem [resolvable:$false] %s4430_s27 }
 0x216   : > { %s4432_s4 = scalar_lea.vmem %s4431_s27, 256  ;;  %p4433_p6 = scmp.lt.s32.totalorder %s5146_s2, %s4431_s27 }
 0x217   : > { %p4428_p1 = pnand %p4426_p12, %p4412_p8  ;;  %p4434_p13 = scmp.lt.s32.totalorder %s4432_s4, %s4425_s7 }
 0x219   : > { %p4429_p10 = pneg %p4428_p1  ;;  %p4435_p0 = por %p4434_p13, %p4433_p6 }
 0x21b   : > { %p4436_p2 = pnand %p4435_p0, %p4429_p10 }
 0x21d   : > { %4439 = shalt.err (!%p4436_p2)
}
 0x21e   : > { %3679 = dma.hbm_to_vmem [thread:$0]  (!%p5142_p11), %s5140_s0, 128, %s5146_s2, %s722_s8  }
 0x21f   : > { %s5645_s9 = sshll.u32 %s5129_s21, 4  ;;  %s739_s30 = sand.u32 1, %s5634_s15  }
 0x220   : > { %s743_s20 = scalar_lea.vmem [#allocation6], %s5645_s9  ;;  %s3312_s27 = sshll.u32 %s5634_s15, 8 }
 0x221   : > { %s750_s1 = sshll.u32 %s743_s20, 4  ;;  %s5646_s10 = sld [smem:[#allocation53_spill]]  ;;  %s5178_s1 = int_to_ptr.vmem [resolvable:$true] %s750_s1 }
 0x222   : > { %s5186_s12 = scalar_lea.sflag [#allocation7], %s739_s30 }
 0x227   : > { %s5184_s11 = scalar_lea.hbm %s5646_s10, %s3312_s27  ;;  %s4445_s15 = scalar_lea.hbm %s5646_s10, 512 }
 0x228   : > { %s4440_s13 = scalar_lea.hbm %s5184_s11, 256  ;;  %p4446_p5 = scmp.lt.u32.totalorder %s5184_s11, %s5646_s10 }
 0x229   : > { %p4441_p6 = scmp.ne.s32.totalorder %s5184_s11, %s4440_s13  ;;  %p4447_p9 = scmp.lt.u32.totalorder %s4445_s15, %s4440_s13 }
 0x22a   : > { %p4449_p12 = scmp.lt.u32.totalorder %s4440_s13, %s5184_s11 }
 0x22b   : > { %p4443_p10 = pnand %p4441_p6, %p4412_p8  ;;  %p4448_p4 = por %p4447_p9, %p4446_p5 }
 0x22d   : > { %p4444_p3 = pneg %p4443_p10  ;;  %p4450_p1 = por %p4449_p12, %p4448_p4 }
 0x22f   : > { %p4451_p13 = pnand %p4450_p1, %p4444_p3 }
 0x231   : > { %4454 = shalt.err (!%p4451_p13)
}
 0x232   : > { %s4455_s9 = scalar_lea.vmem %s5178_s1, 256  ;;  %s4602_s20 = smov [#allocation6]  }
 0x233   : > { %p4456_p0 = scmp.ne.s32.totalorder %s5178_s1, %s4455_s9  ;;  %s4460_s30 = sshll.u32 %s4602_s20, 4  ;;  %s4461_s30 = int_to_ptr.vmem [resolvable:$false] %s4460_s30 }
 0x234   : > { %s4462_s27 = scalar_lea.vmem %s4461_s30, 512  ;;  %p4463_p10 = scmp.lt.s32.totalorder %s5178_s1, %s4461_s30 }
 0x235   : > { %p4458_p2 = pnand %p4456_p0, %p4412_p8  ;;  %p4464_p5 = scmp.lt.s32.totalorder %s4462_s27, %s4455_s9 }
 0x237   : > { %p4459_p6 = pneg %p4458_p2  ;;  %p4465_p9 = por %p4464_p5, %p4463_p10 }
 0x239   : > { %p4466_p4 = pnand %p4465_p9, %p4459_p6 }
 0x23b   : > { %4469 = shalt.err (!%p4466_p4)
}
 0x23c   : > { %3682 = dma.hbm_to_vmem [thread:$0]  (!%p5142_p11), %s5184_s11, 256, %s5178_s1, %s5186_s12, %s5623_s17, %s5623_s17, %s5622_s23  }
 0x23d   : > { %s5647_s13 = sld [smem:[#allocation51_spill]] }
 0x243   : > { %p5648_p8 = scmp.ne.s32.totalorder %s5647_s13, 0 }
 0x244   : > { %s5649_s7 = sld [smem:[#allocation47_spill]] (!%p5648_p8) }
 0x245   : > { %762 = sbr.rel (%p5648_p8) target bundleno = 5172 (0x1434), region = 100 }
 0x24a   : > { %s5218_s4 = sand.u32 (!%p5648_p8), 1, %s5649_s7  }
 0x24b   : > { %s3175_s8 = sshll.u32 (!%p5648_p8), %s5218_s4, 3  ;;  %s765_s0 = scalar_lea.sflag (!%p5648_p8), [#allocation4], %s5218_s4 }
 0x24c   : > { %s5224_s6 = scalar_lea.vmem [#allocation3], %s3175_s8 }
 0x24d   : > { %4515 = dma.done.wait (%p5119_p7), %s765_s0, 128  }
 0x24e   : > { %4517 = vsyncadd (%p5119_p7), %s765_s0, 4294967168  ;;  %s5650_s11 = sld [smem:[#allocation50_spill]]  ;;  %s3176_s23 = sshll.u32 %s5218_s4, 4 }
 0x24f   : > { %s5232_s1 = scalar_lea.vmem [#allocation6], %s3176_s23 }
 0x254   : > { %s773_s12 = sand.u32 1, %s5650_s11  }
 0x255   : > { %s774_s17 = scalar_lea.sflag [#allocation7], %s773_s12 }
 0x256   : > { %4519 = dma.done.wait (%p5119_p7), %s774_s17, 256  }
 0x257   : > { %4521 = vsyncadd (%p5119_p7), %s774_s17, 4294967040  ;;  %p5651_p11 = scmp.eq.s32.totalorder %s5650_s11, 0 }
 0x259   : > { %4523 = dma.done.wait (%p5651_p11), [#allocation7], 3072   ;;  %p5652_p3 = pmov %p5651_p11 }
 0x25b   : > { %4525 = vsyncadd (%p5652_p3), [#allocation7], 4294964224  ;;  %p5653_p12 = pmov %p5652_p3 }
 0x25c   : > { %p5654_p1 = pmov %p5652_p3 }
 0x25d   : > { %4527 = dma.done.wait (%p5653_p12), [#allocation10], 64  }
 0x25e   : > { %4529 = vsyncadd (%p5654_p1), [#allocation10], 4294967232  ;;  %p5655_p13 = pmov %p5654_p1 }
 0x25f   : > { %p5656_p0 = pmov %p5654_p1 }
 0x260   : > { %4531 = dma.done.wait (%p5655_p13), [#allocation13], 32  }
 0x261   : > { %4533 = vsyncadd (%p5656_p0), [#allocation13], 4294967264  ;;  %p5657_p7 = pmov %p5656_p0 }
 0x262   : > { %p5658_p2 = pmov %p5656_p0 }
 0x263   : > { %4535 = dma.done.wait (%p5657_p7), [#allocation16], 2080  }
 0x264   : > { %4537 = vsyncadd (%p5658_p2), [#allocation16], 4294965216  ;;  %p5659_p6 = pmov %p5656_p0 }
 0x265   : > { %p5660_p10 = pmov %p5656_p0 }
 0x266   : > { %4539 = dma.done.wait (%p5659_p6), [#allocation19], 1040  }
 0x267   : > { %4541 = vsyncadd (%p5660_p10), [#allocation19], 4294966256  ;;  %p5661_p5 = pmov %p5656_p0 }
 0x268   : > { %p5662_p9 = pmov %p5656_p0 }
 0x269   : > { %4543 = dma.done.wait (%p5661_p5), [#allocation22], 32  }
 0x26a   : > { %4545 = vsyncadd (%p5662_p9), [#allocation22], 4294967264  ;;  %p5663_p4 = pmov %p5656_p0 }
 0x26b   : > { %p5664_p8 = pmov %p5656_p0 }
 0x26c   : > { %4547 = dma.done.wait (%p5663_p4), [#allocation25], 2080  }
 0x26d   : > { %4549 = vsyncadd (%p5664_p8), [#allocation25], 4294965216  ;;  %p5665_p11 = pmov %p5656_p0 }
 0x26e   : > { %p5666_p3 = pmov %p5656_p0 }
 0x26f   : > { %4551 = dma.done.wait (%p5665_p11), [#allocation28], 2064  }
 0x270   : > { %4553 = vsyncadd (%p5666_p3), [#allocation28], 4294965232  ;;  %p5667_p12 = pmov %p5656_p0 }
 0x271   : > { %p5668_p1 = pmov %p5656_p0 }
 0x272   : > { %4555 = dma.done.wait (%p5667_p12), [#allocation31], 32  }
 0x273   : > { %4557 = vsyncadd (%p5668_p1), [#allocation31], 4294967264  ;;  %v4603_v0 = vmov 0   ;;  %v4604_v1 = vmov 0.0   ;;  %v3784_v2 = vld [vmem:[#allocation8 + $0x4] ss:$12 sps:$4 sm:$0xff]   ;;  %v946_v28 = vlaneseq }
 0x274   : > { %1121 = vmatprep.mubr.bf16.mxu0 %v4603_v0  ;;  %3394 = vmatprep.subr.bf16.mxu1 %v4604_v1  ;;  %v3786_v3 = vld [vmem:[#allocation8] ss:$12 sps:$4 sm:$0xff]   ;;  %v3787_v4 = vld [vmem:[#allocation8 + $0x1c] ss:$12 sps:$4 sm:$0xff]   ;;  %v3789_v5 = vld [vmem:[#allocation8 + $0x18] ss:$12 sps:$4 sm:$0xff]  }
 0x275   : > { %1089 = vmatprep.subr.bf16.mxu0 %v3784_v2  ;;  %v3790_v6 = vld [vmem:[#allocation8 + $0x34] ss:$12 sps:$4 sm:$0xff]   ;;  %v3792_v7 = vld [vmem:[#allocation8 + $0x30] ss:$12 sps:$4 sm:$0xff]   ;;  %v3793_v8 = vld [vmem:[#allocation8 + $0x4c] ss:$12 sps:$4 sm:$0xff]  }
 0x276   : > { %1090 = vmatpush1.bf16.msra.mxu0 %v3786_v3  ;;  %v3795_v9 = vld [vmem:[#allocation8 + $0x48] ss:$12 sps:$4 sm:$0xff]   ;;  %v3796_v11 = vld [vmem:[#allocation8 + $0x64] ss:$12 sps:$4 sm:$0xff]   ;;  %v3809_v12 = vld [vmem:[#allocation8 + $0x20] ss:$12 sps:$4 sm:$0xff]  }
 0x277   : > { %1091 = vmatprep.subr.bf16.mxu0 %v3787_v4  ;;  %v3808_v10 = vld [vmem:[#allocation8 + $0x8] ss:$12 sps:$4 sm:$0xff]   ;;  %v3798_v13 = vld [vmem:[#allocation8 + $0x60] ss:$12 sps:$4 sm:$0xff]   ;;  %v3801_v15 = vld [vmem:[#allocation8 + $0x78] ss:$12 sps:$4 sm:$0xff]  }
 0x278   : > { %3395 = vmatpush3.bf16.msra.mxu1 %v3808_v10  ;;  %v3799_v14 = vld [vmem:[#allocation8 + $0x7c] ss:$12 sps:$4 sm:$0xff]   ;;  %v3810_v16 = vld [vmem:[#allocation8 + $0x38] ss:$12 sps:$4 sm:$0xff]   ;;  %v3802_v17 = vld [vmem:[#allocation8 + $0x94] ss:$12 sps:$4 sm:$0xff]  }
 0x279   : > { %3396 = vmatprep.subr.bf16.mxu1 %v4604_v1  ;;  %v3811_v18 = vld [vmem:[#allocation8 + $0x50] ss:$12 sps:$4 sm:$0xff]   ;;  %v3805_v20 = vld [vmem:[#allocation8 + $0xac] ss:$12 sps:$4 sm:$0xff]   ;;  %v3812_v21 = vld [vmem:[#allocation8 + $0x68] ss:$12 sps:$4 sm:$0xff]  }
 0x27a   : > { %1092 = vmatpush1.bf16.msra.mxu0 %v3789_v5  ;;  %v3804_v19 = vld [vmem:[#allocation8 + $0x90] ss:$12 sps:$4 sm:$0xff]   ;;  %v3807_v22 = vld [vmem:[#allocation8 + $0xa8] ss:$12 sps:$4 sm:$0xff]   ;;  %v3813_v24 = vld [vmem:[#allocation8 + $0x80] ss:$12 sps:$4 sm:$0xff]  }
 0x27b   : > { %1093 = vmatprep.subr.bf16.mxu0 %v3790_v6  ;;  %v5280_v23 = vld [vmem:[%s5224_s6] sm:$0xff]  ;;  %vm4605_vm0 = vmmov 0   ;;  %v947_v29 = vshrl.u32 %v946_v28, 7  ;;  %v944_v31 = vld [vmem:[#allocation9] sm:$0x7]  ;;  %vm1173_vm1 = vcmask 261120  }
 0x27c   : > { %3397 = vmatpush3.bf16.msra.mxu1 %v3809_v12  ;;  %v911_v25 = vpack.c.bf16 %v5280_v23, %v5280_v23  ;;  %v3814_v26 = vld [vmem:[#allocation8 + $0x98] ss:$12 sps:$4 sm:$0xff]   ;;  %v3815_v27 = vld [vmem:[#allocation8 + $0xb0] ss:$12 sps:$4 sm:$0xff]   ;;  %3410 = vmatprep.mubr.msk.bf16.mxu1 %vm4605_vm0, %v4604_v1  ;;  %s4606_s22 = smov 96   ;;  %s4607_s15 = smov 64  }
 0x27d   : > { %3398 = vmatprep.subr.bf16.mxu1 %v4604_v1  ;;  %v5296_v30 = vsub.s32 1, %v947_v29  ;;  %v5298_v32 = vsub.s32 0, %v947_v29  ;;  %s4608_s21 = smov 32   ;;  %v956_v44 = vsub.s32 2, %v947_v29  ;;  %vm1237_vm2 = vcmask 1043456   ;;  %s5669_s20 = sld [smem:[#allocation56_spill]] }
 0x27e   : > { %1094 = vmatpush1.bf16.msra.mxu0 %v3792_v7  ;;  %vm1221_vm3 = vcmask 64512   ;;  %vm1400_vm4 = vcmask 523520   ;;  %vm1517_vm5 = vcmask 785920   ;;  %vm1634_vm6 = vcmask 1048320   ;;  %s5670_s0 = sld [smem:[#allocation69_spill]]  ;;  %s2882_s12 = scalar_lea.sflag [#allocation5], %s5218_s4 }
 0x27f   : > { %1095 = vmatprep.subr.bf16.mxu0 %v3793_v8  ;;  %v953_v33 = vrot.slane %v944_v31, %v5296_v30  ;;  %v949_v34 = vrot.slane %v944_v31, %v5298_v32  ;;  %v957_v45 = vrot.slane %v944_v31, %v956_v44  ;;  %vm1980_vm7 = vcmask 130048   ;;  %p5671_p0 = scmp.ne.s32.totalorder %s5641_s3, 0 }
 0x280   : > { %3399 = vmatpush3.bf16.msra.mxu1 %v3810_v16 }
 0x281   : > { %3400 = vmatprep.subr.bf16.mxu1 %v4604_v1 }
 0x282   : > { %1096 = vmatpush1.bf16.msra.mxu0 %v3795_v9 }
 0x283   : > { %1097 = vmatprep.subr.bf16.mxu0 %v3796_v11 }
 0x284   : > { %3401 = vmatpush3.bf16.msra.mxu1 %v3811_v18 }
 0x285   : > { %3402 = vmatprep.subr.bf16.mxu1 %v4604_v1 }
 0x286   : > { %1098 = vmatpush1.bf16.msra.mxu0 %v3798_v13 }
 0x287   : > { %1099 = vmatprep.subr.bf16.mxu0 %v3799_v14 }
 0x288   : > { %3403 = vmatpush3.bf16.msra.mxu1 %v3812_v21 }
 0x289   : > { %3404 = vmatprep.subr.bf16.mxu1 %v4604_v1 }
 0x28a   : > { %1100 = vmatpush1.bf16.msra.mxu0 %v3801_v15 }
 0x28b   : > { %1101 = vmatprep.subr.bf16.mxu0 %v3802_v17 }
 0x28c   : > { %3405 = vmatpush3.bf16.msra.mxu1 %v3813_v24 }
 0x28d   : > { %3406 = vmatprep.subr.bf16.mxu1 %v4604_v1 }
 0x28e   : > { %1102 = vmatpush1.bf16.msra.mxu0 %v3804_v19 }
 0x28f   : > { %1103 = vmatprep.subr.bf16.mxu0 %v3805_v20 }
 0x290   : > { %3407 = vmatpush3.bf16.msra.mxu1 %v3814_v26 }
 0x291   : > { %3408 = vmatprep.subr.bf16.mxu1 %v4604_v1 }
 0x292   : > { %1104 = vmatpush1.bf16.msra.mxu0 %v3807_v22 }
 0x293   : > { %3438 = vmatprep.subr.bf16.mxu0 %v4604_v1 }
 0x294   : > { %3409 = vmatpush3.bf16.msra.mxu1 %v3815_v27 }
 0x295   : > { %1122 = vmatmul.mubr.bf16.vlgmr.msra.gmra.mrb[0].mxu0 %v911_v25  ;;  %3414 = vmatprep.subr.bf16.mxu1 %v4604_v1 }
 0x296   : > { %3440 = vmatprep.mubr.msk.bf16.mxu0 %vm4605_vm0, %v4604_v1 }
 0x297   : > { %3411 = vmatmul.mubr.bf16.vlgmr.msra.gmra.mrb[0].mxu1 %v911_v25 }
 0x298   : > { %3416 = vmatprep.mubr.msk.bf16.mxu1 %vm4605_vm0, %v4604_v1 }
 0x368   : > { %v1123_v35 = vpop.f32.mrb[0].mxu0 }
 0x369   : > { %v1125_v36 = vpop.f32.mrb[1].mxu0  ;;  %v1124_v40 = vadd.f32 %v1123_v35, %v949_v34 }
 0x36a   : > { %v1126_v37 = vadd.f32 %v1125_v36, %v953_v33  ;;  %v1127_v38 = vpop.f32.mrb[2].mxu0  ;;  %v1164_v46 = vpop.f32.mrb[0].mxu1 }
 0x36b   : > { %v1128_v39 = vpop.f32.mrb[3].mxu0  ;;  %v1170_v43 = vpack.c.bf16 %v1124_v40, %v1124_v40  ;;  %v1165_v47 = vadd.f32 %v1164_v46, %v957_v45  ;;  %v3412_v48 = vpop.f32.mrb[1].mxu1 }
 0x36c   : > { %v1171_v41 = vpack.c.bf16 %v1126_v37, %v1126_v37  ;;  %v1167_v49 = vpop.f32.mrb[2].mxu1 }
 0x36d   : > { %v5312_v50 = vpack.c.bf16 %v1165_v47, %v1165_v47  ;;  %v3413_v51 = vpop.f32.mrb[3].mxu1 }
 0x36e   : > { %1286 = vrot.lane.b32.xlu1 %v1171_v41, %s4606_s22  ;;  %v1178_v42 = vsel %vm1173_vm1, %v1171_v41, 0 }
 0x36f   : > { %3415 = vmatpush3.bf16.xpose.msra.mxu1 %v1178_v42  ;;  %v1239_v52 = vsel %vm1237_vm2, %v5312_v50, 0 }
 0x370   : > { %3420 = vmatprep.subr.bf16.mxu1 %v4604_v1 }
 0x372   : > { %1283 = vrot.lane.b32.xlu1 %v1170_v43, %s4606_s22 }
 0x376   : > { %1402 = vrot.lane.b32.xlu1 %v1170_v43, %s4607_s15  ;;  %3417 = vmatmul.mubr.msk.bf16.vlgmr.msra.gmra.mrb[4].mxu1 %vm1173_vm1, %v1170_v43 }
 0x377   : > { %3422 = vmatprep.mubr.msk.bf16.mxu1 %vm4605_vm0, %v4604_v1  ;;  %3421 = vmatpush3.bf16.msra.mxu1 %v1239_v52 }
 0x378   : > { %3426 = vmatprep.subr.bf16.mxu1 %v4604_v1 }
 0x37a   : > { %1521 = vrot.lane.b32.xlu1 %v1171_v41, %s4608_s21 }
 0x37e   : > { %1519 = vrot.lane.b32.xlu1 %v1170_v43, %s4608_s21 }
 0x3e0   : > { %v1287_v2 = vpop.permute.xlu1 %1286 }
 0x3e1   : > { %v1292_v13 = vsel %vm1173_vm1, %v1287_v2, 0 }
 0x3e4   : > { %v1284_v3 = vpop.permute.xlu1 %1283 }
 0x3e8   : > { %v1403_v5 = vpop.permute.xlu1 %1402 }
 0x3ec   : > { %v1522_v8 = vpop.permute.xlu1 %1521 }
 0x3ed   : > { %v1527_v11 = vsel %vm1173_vm1, %v1522_v8, 0 }
 0x3f0   : > { %v1520_v14 = vpop.permute.xlu1 %1519 }
 0x449   : > { %v1214_v53 = vpop.f32.mrb[4].mxu1 }
 0x44a   : > { %v1220_v54 = vmul.f32 0.17677669, %v1214_v53  ;;  %v3418_v55 = vpop.f32.mrb[5].mxu1 }
 0x44b   : > { %v1217_v56 = vpop.f32.mrb[6].mxu1 }
 0x44c   : > { %v3419_v57 = vpop.f32.mrb[7].mxu1  ;;  %v1222_v58 = vsel %vm1221_vm3, %v1220_v54, -inf }
 0x44d   : > { %1223 = vmax.xlane.f32.xlu0 %v1222_v58 }
 0x4da   : > { %v1224_v59 = vpop.xlane.xlu0 %1223 }
 0x4db   : > { %v1225_v60 = vsub.f32 %v1220_v54, %v1224_v59 }
 0x4dd   : > { %v1226_v61 = vmul.f32 1.442695, %v1225_v60 }
 0x4df   : > { %3896 = vpow2.f32 %v1226_v61 }
 0x4e9   : > { %v3897_v62 = vpop.eup %3896 }
 0x4ea   : > { %v1228_v63 = vsel %vm1221_vm3, %v3897_v62, 0.0 }
 0x4eb   : > { %1229 = vadd.xlane.f32.xlu0 %v1228_v63 }
 0x501   : > { %1404 = vrot.lane.b32.xlu0 %v1171_v41, %s4607_s15 }
 0x578   : > { %v1230_v4 = vpop.xlane.xlu0 %1229 }
 0x579   : > { %3898 = vrcp.f32 %v1230_v4 }
 0x57c   : > { %v1405_v6 = vpop.permute.xlu0 %1404 }
 0x57d   : > { %v1410_v7 = vsel %vm1173_vm1, %v1405_v6, 0 }
 0x57e   : > { %3439 = vmatpush3.bf16.xpose.msra.mxu0 %v1410_v7 }
 0x57f   : > { %3450 = vmatprep.subr.bf16.mxu0 %v4604_v1 }
 0x583   : > { %v3899_v9 = vpop.eup %3898 }
 0x584   : > { %v1232_v10 = vmul.f32 %v3899_v9, %v3897_v62 }
 0x585   : > { %3441 = vmatmul.mubr.msk.bf16.vlgmr.msra.gmra.mrb[4].mxu0 %vm1173_vm1, %v1403_v5 }
 0x586   : > { %3451 = vmatpush3.bf16.xpose.msra.mxu0 %v1527_v11  ;;  %v1233_v12 = vpack.c.bf16 %v1232_v10, %v1232_v10  ;;  %3452 = vmatprep.mubr.msk.bf16.mxu0 %vm4605_vm0, %v4604_v1  ;;  %v3816_v11 = vld [vmem:[%s5669_s20] sm:$0xff]  }
 0x587   : > { %3462 = vmatprep.subr.bf16.mxu0 %v4604_v1 }
 0x588   : > { %3423 = vmatmul.mubr.msk.bf16.vlgmr.msra.gmra.mrb[8].mxu1 %vm1221_vm3, %v1233_v12  ;;  %v3817_v12 = vld [vmem:[%s5669_s20 + $0x8] sm:$0xff]  }
 0x589   : > { %3427 = vmatpush3.bf16.xpose.msra.mxu1 %v1292_v13  ;;  %3428 = vmatprep.mubr.msk.bf16.mxu1 %vm4605_vm0, %v4604_v1  ;;  %v3818_v13 = vld [vmem:[%s5669_s20 + $0x10] sm:$0xff]  }
 0x58a   : > { %3432 = vmatprep.subr.bf16.mxu1 %v4604_v1 }
 0x58d   : > { %3453 = vmatmul.mubr.msk.bf16.vlgmr.msra.gmra.mrb[8].mxu0 %vm1173_vm1, %v1520_v14  ;;  %v3819_v14 = vld [vmem:[%s5669_s20 + $0x18] sm:$0xff]  }
 0x58e   : > { %3478 = vmatprep.mubr.msk.bf16.mxu0 %vm4605_vm0, %v4604_v1  ;;  %3463 = vmatpush3.bf16.msra.mxu0 %v3816_v11 }
 0x58f   : > { %3464 = vmatprep.subr.bf16.mxu0 %v4604_v1 }
 0x590   : > { %3429 = vmatmul.mubr.msk.bf16.vlgmr.msra.gmra.mrb[12].mxu1 %vm1173_vm1, %v1284_v3 }
 0x591   : > { %3434 = vmatprep.mubr.msk.bf16.mxu1 %vm4605_vm0, %v4604_v1 }
 0x592   : > { %3465 = vmatpush3.bf16.msra.mxu0 %v3817_v12 }
 0x593   : > { %3466 = vmatprep.subr.bf16.mxu0 %v4604_v1 }
 0x596   : > { %3467 = vmatpush3.bf16.msra.mxu0 %v3818_v13 }
 0x597   : > { %3468 = vmatprep.subr.bf16.mxu0 %v4604_v1 }
 0x59a   : > { %3469 = vmatpush3.bf16.msra.mxu0 %v3819_v14 }
 0x59b   : > { %3470 = vmatprep.subr.bf16.mxu0 %v4604_v1 }
 0x658   : > { %v1446_v15 = vpop.f32.mrb[4].mxu0 }
 0x659   : > { %v1452_v16 = vmul.f32 0.17677669, %v1446_v15  ;;  %v3442_v17 = vpop.f32.mrb[5].mxu0  ;;  %v3820_v15 = vld [vmem:[%s5669_s20 + $0x20] sm:$0xff]  }
 0x65a   : > { %v1449_v18 = vpop.f32.mrb[6].mxu0  ;;  %3471 = vmatpush3.bf16.msra.mxu0 %v3820_v15 }
 0x65b   : > { %v1275_v19 = vpop.f32.mrb[8].mxu1  ;;  %v3443_v20 = vpop.f32.mrb[7].mxu0  ;;  %v1453_v21 = vsel %vm1221_vm3, %v1452_v16, -inf  ;;  %3472 = vmatprep.subr.bf16.mxu0 %v4604_v1 }
 0x65c   : > { %1281 = vst.msk [vmem:[#allocation2] sm:$0xff] %vm1173_vm1, %v1275_v19  ;;  %1454 = vmax.xlane.f32.xlu0 %v1453_v21  ;;  %v3424_v22 = vpop.f32.mrb[9].mxu1  ;;  %v3822_v21 = vld [vmem:[%s5669_s20 + $0x30] sm:$0xff]  }
 0x65d   : > { %v1278_v24 = vpop.f32.mrb[10].mxu1  ;;  %v3823_v22 = vld [vmem:[%s5669_s20 + $0x38] sm:$0xff]  }
 0x65e   : > { %v3425_v25 = vpop.f32.mrb[11].mxu1 }
 0x660   : > { %v1563_v26 = vpop.f32.mrb[8].mxu0 }
 0x661   : > { %v3454_v27 = vpop.f32.mrb[9].mxu0  ;;  %v1569_v36 = vmul.f32 0.17677669, %v1563_v26 }
 0x662   : > { %v1566_v28 = vpop.f32.mrb[10].mxu0 }
 0x663   : > { %v1328_v29 = vpop.f32.mrb[12].mxu1  ;;  %v3455_v31 = vpop.f32.mrb[11].mxu0  ;;  %v1570_v39 = vsel %vm1221_vm3, %v1569_v36, -inf }
 0x664   : > { %v1334_v33 = vmul.f32 0.17677669, %v1328_v29  ;;  %v3430_v34 = vpop.f32.mrb[13].mxu1 }
 0x665   : > { %v1331_v35 = vpop.f32.mrb[14].mxu1 }
 0x666   : > { %v3431_v37 = vpop.f32.mrb[15].mxu1  ;;  %v1335_v38 = vsel %vm1221_vm3, %v1334_v33, -inf }
 0x667   : > { %1336 = vmax.xlane.f32.xlu1 %v1335_v38 }
 0x66b   : > { %1571 = vmax.xlane.f32.xlu1 %v1570_v39  ;;  %v3824_v39 = vld [vmem:[#allocation15] ss:$8 sps:$4 sm:$0xff]  }
 0x6e9   : > { %v1455_v40 = vpop.xlane.xlu0 %1454 }
 0x6ea   : > { %v1456_v41 = vsub.f32 %v1452_v16, %v1455_v40  ;;  %v3821_v16 = vld [vmem:[%s5669_s20 + $0x28] sm:$0xff]  }
 0x6eb   : > { %3473 = vmatpush3.bf16.msra.mxu0 %v3821_v16  ;;  %v3826_v40 = vld [vmem:[#allocation15 + $0x4] ss:$8 sps:$4 sm:$0xff]  }
 0x6ec   : > { %v1457_v42 = vmul.f32 1.442695, %v1456_v41  ;;  %3474 = vmatprep.subr.bf16.mxu0 %v4604_v1  ;;  %v3829_v41 = vld [vmem:[#allocation15 + $0x14] ss:$8 sps:$4 sm:$0xff]  }
 0x6ee   : > { %3900 = vpow2.f32 %v1457_v42  ;;  %v3827_v42 = vld [vmem:[#allocation15 + $0x10] ss:$8 sps:$4 sm:$0xff]  }
 0x6ef   : > { %3475 = vmatpush3.bf16.msra.mxu0 %v3822_v21 }
 0x6f0   : > { %3476 = vmatprep.subr.bf16.mxu0 %v4604_v1 }
 0x6f3   : > { %3477 = vmatpush3.bf16.msra.mxu0 %v3823_v22 }
 0x6f4   : > { %v1337_v43 = vpop.xlane.xlu1 %1336  ;;  %3482 = vmatprep.subr.bf16.mxu0 %v4604_v1 }
 0x6f5   : > { %v1338_v44 = vsub.f32 %v1334_v33, %v1337_v43  ;;  %v3832_v43 = vld [vmem:[#allocation15 + $0x24] ss:$8 sps:$4 sm:$0xff]  }
 0x6f7   : > { %v1339_v49 = vmul.f32 1.442695, %v1338_v44  ;;  %v3830_v44 = vld [vmem:[#allocation15 + $0x20] ss:$8 sps:$4 sm:$0xff]  }
 0x6f8   : > { %v3901_v45 = vpop.eup %3900  ;;  %v1572_v46 = vpop.xlane.xlu1 %1571 }
 0x6f9   : > { %v1573_v47 = vsub.f32 %v1569_v36, %v1572_v46  ;;  %v1459_v48 = vsel %vm1221_vm3, %v3901_v45, 0.0  ;;  %v3833_v46 = vld [vmem:[#allocation15 + $0x30] ss:$8 sps:$4 sm:$0xff]  }
 0x6fa   : > { %1460 = vadd.xlane.f32.xlu0 %v1459_v48  ;;  %v3836_v48 = vld [vmem:[#allocation15 + $0x40] ss:$8 sps:$4 sm:$0xff]  }
 0x6fb   : > { %v1574_v51 = vmul.f32 1.442695, %v1573_v47  ;;  %v3838_v47 = vld [vmem:[#allocation15 + $0x44] ss:$8 sps:$4 sm:$0xff]  }
 0x6fd   : > { %3902 = vpow2.f32 %v1574_v51  ;;  %v3839_v51 = vld [vmem:[#allocation15 + $0x50] ss:$8 sps:$4 sm:$0xff]  }
 0x6fe   : > { %3904 = vpow2.f32 %v1339_v49  ;;  %v3841_v49 = vld [vmem:[#allocation15 + $0x54] ss:$8 sps:$4 sm:$0xff]  }
 0x707   : > { %v3903_v52 = vpop.eup %3902 }
 0x708   : > { %v1576_v53 = vsel %vm1221_vm3, %v3903_v52, 0.0  ;;  %v3905_v54 = vpop.eup %3904 }
 0x709   : > { %1577 = vadd.xlane.f32.xlu1 %v1576_v53  ;;  %v1341_v55 = vsel %vm1221_vm3, %v3905_v54, 0.0  ;;  %v3842_v53 = vld [vmem:[#allocation15 + $0x60] ss:$8 sps:$4 sm:$0xff]  }
 0x70d   : > { %1342 = vadd.xlane.f32.xlu1 %v1341_v55  ;;  %v3845_v55 = vld [vmem:[#allocation15 + $0x70] ss:$8 sps:$4 sm:$0xff]  }
 0x710   : > { %1348 = vrot.lane.b32.xlu0 %v5312_v50, %s4606_s22 }
 0x71e   : > { %1465 = vrot.lane.b32.xlu1 %v5312_v50, %s4607_s15 }
 0x722   : > { %1582 = vrot.lane.b32.xlu1 %v5312_v50, %s4608_s21 }
 0x787   : > { %v1461_v56 = vpop.xlane.xlu0 %1460 }
 0x78b   : > { %v1349_v57 = vpop.permute.xlu0 %1348 }
 0x78c   : > { %v1354_v58 = vsel %vm1237_vm2, %v1349_v57, 0  ;;  %v910_v57 = vld [vmem:[%s5232_s1 + $0x8] sm:$0xff] }
 0x78d   : > { %3433 = vmatpush3.bf16.msra.mxu1 %v1354_v58 }
 0x78e   : > { %3444 = vmatprep.subr.bf16.mxu1 %v4604_v1 }
 0x796   : > { %v1578_v59 = vpop.xlane.xlu1 %1577 }
 0x79a   : > { %v1343_v60 = vpop.xlane.xlu1 %1342 }
 0x79b   : > { %3906 = vrcp.f32 %v1343_v60 }
 0x79c   : > { %3908 = vrcp.f32 %v1461_v56  ;;  %v909_v56 = vld [vmem:[%s5232_s1] sm:$0xff]  ;;  %s3309_s1 = sshll.u32 %s5650_s11, 7 }
 0x79d   : > { %3910 = vrcp.f32 %v1578_v59  ;;  %v1778_v58 = vpack.c.bf16 %v910_v57, %v909_v56  ;;  %v3227_v59 = vld [vmem:[#allocation11] ss:$0 sm:$0xff]  ;;  %s5496_s6 = scalar_lea.hbm %s5670_s0, %s3309_s1 }
 0x79e   : > { %v1466_v63 = vpop.permute.xlu1 %1465 }
 0x79f   : > { %v1471_v4 = vsel %vm1237_vm2, %v1466_v63, 0 }
 0x7a2   : > { %v1583_v5 = vpop.permute.xlu1 %1582 }
 0x7a3   : > { %v1588_v8 = vsel %vm1237_vm2, %v1583_v5, 0 }
 0x7a5   : > { %v3907_v61 = vpop.eup %3906 }
 0x7a6   : > { %v1345_v62 = vmul.f32 %v3907_v61, %v3905_v54  ;;  %v3909_v3 = vpop.eup %3908  ;;  %v3847_v54 = vld [vmem:[#allocation15 + $0x74] ss:$8 sps:$4 sm:$0xff]  }
 0x7a7   : > { %v1463_v50 = vmul.f32 %v3909_v3, %v3901_v45  ;;  %v3911_v7 = vpop.eup %3910  ;;  %v3835_v45 = vld [vmem:[#allocation15 + $0x34] ss:$8 sps:$4 sm:$0xff]  }
 0x7a8   : > { %v1346_v2 = vpack.c.bf16 %v1345_v62, %v1345_v62  ;;  %v1580_v9 = vmul.f32 %v3911_v7, %v3903_v52  ;;  %v3844_v52 = vld [vmem:[#allocation15 + $0x64] ss:$8 sps:$4 sm:$0xff]  }
 0x7a9   : > { %v1464_v6 = vpack.c.bf16 %v1463_v50, %v1463_v50 }
 0x7aa   : > { %3435 = vmatmul.mubr.msk.bf16.vlgmr.msra.gmra.mrb[16].mxu1 %vm1221_vm3, %v1346_v2  ;;  %v1581_v10 = vpack.c.bf16 %v1580_v9, %v1580_v9 }
 0x7ab   : > { %3445 = vmatpush3.bf16.msra.mxu1 %v1471_v4  ;;  %3446 = vmatprep.mubr.msk.bf16.mxu1 %vm4605_vm0, %v4604_v1 }
 0x7ac   : > { %3456 = vmatprep.subr.bf16.mxu1 %v4604_v1 }
 0x7b2   : > { %3447 = vmatmul.mubr.msk.bf16.vlgmr.msra.gmra.mrb[20].mxu1 %vm1221_vm3, %v1464_v6 }
 0x7b3   : > { %3457 = vmatpush3.bf16.msra.mxu1 %v1588_v8  ;;  %3458 = vmatprep.mubr.msk.bf16.mxu1 %vm4605_vm0, %v4604_v1  ;;  %v1795_v8 = vld [vmem:[#allocation17] sm:$0x3] }
 0x7b4   : > { %1887 = vmatprep.subr.bf16.mxu1 %v3826_v40  ;;  %v1804_v11 = vrot.slane %v1795_v8, %v5296_v30 }
 0x7ba   : > { %3459 = vmatmul.mubr.msk.bf16.vlgmr.msra.gmra.mrb[24].mxu1 %vm1221_vm3, %v1581_v10  ;;  %v1800_v10 = vrot.slane %v1795_v8, %v5298_v32 }
 0x7bb   : > { %1919 = vmatprep.mubr.bf16.mxu1 %v4603_v0  ;;  %1888 = vmatpush1.bf16.msra.mxu1 %v3824_v39 }
 0x7bc   : > { %1889 = vmatprep.subr.bf16.mxu1 %v3829_v41 }
 0x7bf   : > { %1890 = vmatpush1.bf16.msra.mxu1 %v3827_v42 }
 0x7c0   : > { %1891 = vmatprep.subr.bf16.mxu1 %v3832_v43 }
 0x7c3   : > { %1892 = vmatpush1.bf16.msra.mxu1 %v3830_v44 }
 0x7c4   : > { %1893 = vmatprep.subr.bf16.mxu1 %v3835_v45 }
 0x7c7   : > { %1894 = vmatpush1.bf16.msra.mxu1 %v3833_v46 }
 0x7c8   : > { %1895 = vmatprep.subr.bf16.mxu1 %v3838_v47 }
 0x7cb   : > { %1896 = vmatpush1.bf16.msra.mxu1 %v3836_v48 }
 0x7cc   : > { %1897 = vmatprep.subr.bf16.mxu1 %v3841_v49 }
 0x7cf   : > { %1898 = vmatpush1.bf16.msra.mxu1 %v3839_v51 }
 0x7d0   : > { %1899 = vmatprep.subr.bf16.mxu1 %v3844_v52 }
 0x7d3   : > { %1900 = vmatpush1.bf16.msra.mxu1 %v3842_v53 }
 0x7d4   : > { %1901 = vmatprep.subr.bf16.mxu1 %v3847_v54 }
 0x7d7   : > { %1902 = vmatpush1.bf16.msra.mxu1 %v3845_v55 }
 0x7d8   : > { %3488 = vmatprep.subr.bf16.mxu1 %v4604_v1 }
 0x7da   : > { %1920 = vmatmul.mubr.bf16.vlgmr.msra.gmra.mrb[28].mxu1 %v1778_v58 }
 0x7db   : > { %3490 = vmatprep.mubr.msk.bf16.mxu1 %vm4605_vm0, %v4604_v1 }
 0x87d   : > { %v1390_v17 = vpop.f32.mrb[16].mxu1 }
 0x87e   : > { %1397 = vrot.lane.b32.xlu0 %v1390_v17, %s4608_s21  ;;  %v3436_v18 = vpop.f32.mrb[17].mxu1 }
 0x87f   : > { %v1393_v19 = vpop.f32.mrb[18].mxu1 }
 0x880   : > { %v3437_v20 = vpop.f32.mrb[19].mxu1 }
 0x885   : > { %v1507_v24 = vpop.f32.mrb[20].mxu1 }
 0x886   : > { %1514 = vrot.lane.b32.xlu1 %v1507_v24, %s4607_s15  ;;  %v3448_v25 = vpop.f32.mrb[21].mxu1 }
 0x887   : > { %v1510_v26 = vpop.f32.mrb[22].mxu1  ;;  %v3236_v25 = vld [vmem:[#allocation12] ss:$0 sm:$0xff] }
 0x888   : > { %v3449_v27 = vpop.f32.mrb[23].mxu1 }
 0x889   : > { %v3237_v27 = vld [vmem:[#allocation14] ss:$0 sm:$0xff] }
 0x88d   : > { %v1624_v28 = vpop.f32.mrb[24].mxu1 }
 0x88e   : > { %1631 = vrot.lane.b32.xlu0 %v1624_v28, %s4606_s22  ;;  %v3460_v29 = vpop.f32.mrb[25].mxu1 }
 0x88f   : > { %v1627_v31 = vpop.f32.mrb[26].mxu1 }
 0x890   : > { %v3461_v33 = vpop.f32.mrb[27].mxu1 }
 0x8ad   : > { %v1921_v7 = vpop.f32.mrb[28].mxu1 }
 0x8ae   : > { %v1923_v9 = vpop.f32.mrb[29].mxu1  ;;  %v1922_v14 = vadd.f32 %v1921_v7, %v1800_v10 }
 0x8af   : > { %v1925_v12 = vpop.f32.mrb[30].mxu1  ;;  %v1924_v15 = vadd.f32 %v1923_v9, %v1804_v11 }
 0x8b0   : > { %v1927_v13 = vpop.f32.mrb[31].mxu1  ;;  %v1926_v16 = vadd.f32 %v1925_v12, %v1800_v10 }
 0x8b1   : > { %v1928_v17 = vadd.f32 %v1927_v13, %v1804_v11 }
 0x8b3   : > { %v5412_v18 = vpack.c.bf16 %v1928_v17, %v1924_v15 }
 0x8b5   : > { %3489 = vmatpush3.bf16.msra.mxu1 %v5412_v18 }
 0x8b6   : > { %3500 = vmatprep.subr.bf16.mxu1 %v4604_v1 }
 0x8f0   : > { %v1398_v34 = vpop.permute.xlu0 %1397 }
 0x8f1   : > { %1401 = vst.msk [vmem:[#allocation2] sm:$0xff] %vm1400_vm4, %v1398_v34 }
 0x8f8   : > { %v1515_v35 = vpop.permute.xlu1 %1514 }
 0x8f9   : > { %1518 = vst.msk [vmem:[#allocation2] sm:$0xff] %vm1517_vm5, %v1515_v35 }
 0x900   : > { %v1632_v36 = vpop.permute.xlu0 %1631 }
 0x901   : > { %1635 = vst.msk [vmem:[#allocation2] sm:$0xff] %vm1634_vm6, %v1632_v36 }
 0x908   : > { %v1636_v37 = vld [vmem:[#allocation2] sm:$0xff] }
 0x909   : > { %v1637_v38 = vpack.c.bf16 %v1636_v37, %v1636_v37 }
 0x90b   : > { %3479 = vmatmul.mubr.bf16.vlgmr.msra.gmra.mrb[12].mxu0 %v1637_v38 }
 0x90c   : > { %3484 = vmatprep.mubr.msk.bf16.mxu0 %vm4605_vm0, %v4604_v1 }
 0x9de   : > { %v1743_v60 = vpop.f32.mrb[12].mxu0 }
 0x9df   : > { %v1744_v61 = vadd.f32 %v3227_v59, %v1743_v60  ;;  %v3480_v62 = vpop.f32.mrb[13].mxu0 }
 0x9e0   : > { %v1746_v63 = vpop.f32.mrb[14].mxu0 }
 0x9e1   : > { %v3481_v2 = vpop.f32.mrb[15].mxu0  ;;  %v1749_v3 = vadd.f32 %v1744_v61, %v5280_v23  ;;  %v1931_v23 = vpack.c.bf16 %v1926_v16, %v1922_v14 }
 0x9e3   : > { %1750 = vadd.xlane.f32.xlu1 %v1749_v3  ;;  %v1937_v19 = vsel %vm1173_vm1, %v1931_v23, 0 }
 0x9e4   : > { %3483 = vmatpush3.bf16.xpose.msra.mxu0 %v1937_v19 }
 0x9e5   : > { %3494 = vmatprep.subr.bf16.mxu0 %v4604_v1 }
 0xa70   : > { %v1751_v4 = vpop.xlane.xlu1 %1750 }
 0xa71   : > { %v1753_v50 = vmul.f32 0.0078125, %v1751_v4 }
 0xa73   : > { %v1754_v5 = vsub.f32 %v1749_v3, %v1753_v50 }
 0xa75   : > { %v1755_v6 = vmul.f32 %v1754_v5, %v1754_v5 }
 0xa77   : > { %1756 = vadd.xlane.f32.xlu0 %v1755_v6 }
 0xa8d   : > { %2041 = vrot.lane.b32.xlu0 %v1931_v23, %s4606_s22 }
 0xb04   : > { %v1757_v20 = vpop.xlane.xlu0 %1756 }
 0xb05   : > { %v1758_v21 = vmul.f32 0.0078125, %v1757_v20 }
 0xb07   : > { %v1759_v22 = vadd.f32 1e-05, %v1758_v21 }
 0xb08   : > { %v2042_v31 = vpop.permute.xlu0 %2041 }
 0xb09   : > { %3912 = vrsqrt.f32 %v1759_v22  ;;  %v2047_v34 = vsel %vm1173_vm1, %v2042_v31, 0 }
 0xb13   : > { %v3913_v24 = vpop.eup %3912 }
 0xb14   : > { %v1761_v26 = vmul.f32 %v3913_v24, %v1754_v5 }
 0xb16   : > { %v1769_v28 = vmul.f32 %v3236_v25, %v1761_v26 }
 0xb18   : > { %v5419_v29 = vadd.f32 %v3237_v27, %v1769_v28 }
 0xb1a   : > { %v1930_v33 = vpack.c.bf16 %v5419_v29, %v5419_v29 }
 0xb1c   : > { %2038 = vrot.lane.b32.xlu1 %v1930_v33, %s4606_s22  ;;  %2154 = vrot.lane.b32.xlu0 %v1930_v33, %s4607_s15 }
 0xb1d   : > { %3485 = vmatmul.mubr.msk.bf16.vlgmr.msra.gmra.mrb[16].mxu0 %vm1173_vm1, %v1930_v33 }
 0xb1e   : > { %3495 = vmatpush3.bf16.xpose.msra.mxu0 %v2047_v34  ;;  %3496 = vmatprep.mubr.msk.bf16.mxu0 %vm4605_vm0, %v4604_v1 }
 0xb1f   : > { %3506 = vmatprep.subr.bf16.mxu0 %v4604_v1 }
 0xb20   : > { %2156 = vrot.lane.b32.xlu1 %v1931_v23, %s4607_s15  ;;  %2268 = vrot.lane.b32.xlu0 %v1930_v33, %s4608_s21 }
 0xb24   : > { %2270 = vrot.lane.b32.xlu1 %v1931_v23, %s4608_s21 }
 0xb8e   : > { %v2039_v35 = vpop.permute.xlu1 %2038  ;;  %v2155_v39 = vpop.permute.xlu0 %2154 }
 0xb8f   : > { %3497 = vmatmul.mubr.msk.bf16.vlgmr.msra.gmra.mrb[20].mxu0 %vm1173_vm1, %v2039_v35 }
 0xb90   : > { %3508 = vmatprep.mubr.msk.bf16.mxu0 %vm4605_vm0, %v4604_v1 }
 0xb92   : > { %v2157_v36 = vpop.permute.xlu1 %2156  ;;  %v2269_v41 = vpop.permute.xlu0 %2268 }
 0xb93   : > { %v2162_v37 = vsel %vm1173_vm1, %v2157_v36, 0 }
 0xb94   : > { %3507 = vmatpush3.bf16.xpose.msra.mxu0 %v2162_v37 }
 0xb95   : > { %3518 = vmatprep.subr.bf16.mxu0 %v4604_v1 }
 0xb96   : > { %v2271_v38 = vpop.permute.xlu1 %2270 }
 0xb97   : > { %v2276_v40 = vsel %vm1173_vm1, %v2271_v38, 0 }
 0xb9b   : > { %3509 = vmatmul.mubr.msk.bf16.vlgmr.msra.gmra.mrb[24].mxu0 %vm1173_vm1, %v2155_v39 }
 0xb9c   : > { %3519 = vmatpush3.bf16.xpose.msra.mxu0 %v2276_v40  ;;  %3520 = vmatprep.mubr.msk.bf16.mxu0 %vm4605_vm0, %v4604_v1 }
 0xb9d   : > { %3530 = vmatprep.subr.bf16.mxu0 %v4604_v1 }
 0xba3   : > { %3521 = vmatmul.mubr.msk.bf16.vlgmr.msra.gmra.mrb[28].mxu0 %vm1173_vm1, %v2269_v41 }
 0xba4   : > { %3546 = vmatprep.mubr.msk.bf16.mxu0 %vm4605_vm0, %v4604_v1 }
 0xbf0   : > { %v1973_v42 = vpop.f32.mrb[16].mxu0 }
 0xbf1   : > { %v1979_v43 = vmul.f32 0.17677669, %v1973_v42  ;;  %v3486_v44 = vpop.f32.mrb[17].mxu0 }
 0xbf2   : > { %v1976_v45 = vpop.f32.mrb[18].mxu0 }
 0xbf3   : > { %v3487_v46 = vpop.f32.mrb[19].mxu0  ;;  %v1981_v47 = vsel %vm1980_vm7, %v1979_v43, -inf }
 0xbf4   : > { %1982 = vmax.xlane.f32.xlu1 %v1981_v47 }
 0xc62   : > { %v2083_v48 = vpop.f32.mrb[20].mxu0 }
 0xc63   : > { %v2089_v49 = vmul.f32 0.17677669, %v2083_v48  ;;  %v3498_v51 = vpop.f32.mrb[21].mxu0 }
 0xc64   : > { %v2086_v52 = vpop.f32.mrb[22].mxu0  ;;  %v3848_v51 = vld [vmem:[#allocation18] sm:$0xff]  }
 0xc65   : > { %v3499_v53 = vpop.f32.mrb[23].mxu0  ;;  %v2090_v54 = vsel %vm1980_vm7, %v2089_v49, -inf  ;;  %3531 = vmatpush3.bf16.msra.mxu0 %v3848_v51  ;;  %v3849_v52 = vld [vmem:[#allocation18 + $0x8] sm:$0xff]   ;;  %v3890_v51 = vld [vmem:[#allocation27 + $0x68] sm:$0xff]  }
 0xc66   : > { %2091 = vmax.xlane.f32.xlu0 %v2090_v54  ;;  %3532 = vmatprep.subr.bf16.mxu0 %v4604_v1 }
 0xc69   : > { %3533 = vmatpush3.bf16.msra.mxu0 %v3849_v52  ;;  %v3891_v52 = vld [vmem:[#allocation27 + $0x28] sm:$0xff]  }
 0xc6a   : > { %3534 = vmatprep.subr.bf16.mxu0 %v4604_v1 }
 0xc6e   : > { %v2198_v55 = vpop.f32.mrb[24].mxu0 }
 0xc6f   : > { %v2204_v56 = vmul.f32 0.17677669, %v2198_v55  ;;  %v3510_v57 = vpop.f32.mrb[25].mxu0 }
 0xc70   : > { %v2201_v58 = vpop.f32.mrb[26].mxu0 }
 0xc71   : > { %v3511_v59 = vpop.f32.mrb[27].mxu0  ;;  %v2205_v60 = vsel %vm1980_vm7, %v2204_v56, -inf }
 0xc72   : > { %2206 = vmax.xlane.f32.xlu0 %v2205_v60 }
 0xc76   : > { %v2312_v61 = vpop.f32.mrb[28].mxu0 }
 0xc77   : > { %v2318_v62 = vmul.f32 0.17677669, %v2312_v61  ;;  %v3522_v63 = vpop.f32.mrb[29].mxu0  ;;  %v3852_v61 = vld [vmem:[#allocation18 + $0x20] sm:$0xff]  }
 0xc78   : > { %v2315_v2 = vpop.f32.mrb[30].mxu0  ;;  %v3853_v63 = vld [vmem:[#allocation18 + $0x28] sm:$0xff]  }
 0xc79   : > { %v3523_v3 = vpop.f32.mrb[31].mxu0  ;;  %v2319_v4 = vsel %vm1980_vm7, %v2318_v62, -inf  ;;  %v3854_v2 = vld [vmem:[#allocation18 + $0x30] sm:$0xff]  }
 0xc7a   : > { %2320 = vmax.xlane.f32.xlu1 %v2319_v4  ;;  %v3855_v3 = vld [vmem:[#allocation18 + $0x38] sm:$0xff]  }
 0xc81   : > { %v1983_v50 = vpop.xlane.xlu1 %1982 }
 0xc82   : > { %v1984_v5 = vsub.f32 %v1979_v43, %v1983_v50 }
 0xc84   : > { %v1985_v6 = vmul.f32 1.442695, %v1984_v5 }
 0xc86   : > { %3914 = vpow2.f32 %v1985_v6 }
 0xc90   : > { %v3915_v7 = vpop.eup %3914 }
 0xc91   : > { %v1987_v8 = vsel %vm1980_vm7, %v3915_v7, 0.0 }
 0xc92   : > { %1988 = vadd.xlane.f32.xlu0 %v1987_v8 }
 0xcf3   : > { %v2092_v9 = vpop.xlane.xlu0 %2091 }
 0xcf4   : > { %v2093_v10 = vsub.f32 %v2089_v49, %v2092_v9 }
 0xcf6   : > { %v2094_v11 = vmul.f32 1.442695, %v2093_v10 }
 0xcf8   : > { %3916 = vpow2.f32 %v2094_v11 }
 0xcff   : > { %v2207_v12 = vpop.xlane.xlu0 %2206 }
 0xd00   : > { %v2208_v13 = vsub.f32 %v2204_v56, %v2207_v12  ;;  %v3850_v56 = vld [vmem:[#allocation18 + $0x10] sm:$0xff]  }
 0xd01   : > { %3535 = vmatpush3.bf16.msra.mxu0 %v3850_v56 }
 0xd02   : > { %v3917_v14 = vpop.eup %3916  ;;  %v2209_v15 = vmul.f32 1.442695, %v2208_v13  ;;  %3536 = vmatprep.subr.bf16.mxu0 %v4604_v1 }
 0xd03   : > { %v2096_v16 = vsel %vm1980_vm7, %v3917_v14, 0.0 }
 0xd04   : > { %3918 = vpow2.f32 %v2209_v15  ;;  %2097 = vadd.xlane.f32.xlu1 %v2096_v16 }
 0xd07   : > { %v2321_v20 = vpop.xlane.xlu1 %2320 }
 0xd08   : > { %v2322_v21 = vsub.f32 %v2318_v62, %v2321_v20  ;;  %v3861_v20 = vld [vmem:[#allocation24 + $0x14] ss:$8 sps:$4 sm:$0xff]  }
 0xd0a   : > { %v2323_v22 = vmul.f32 1.442695, %v2322_v21  ;;  %v3859_v21 = vld [vmem:[#allocation24 + $0x10] ss:$8 sps:$4 sm:$0xff]  }
 0xd0e   : > { %v3919_v17 = vpop.eup %3918 }
 0xd0f   : > { %v2211_v23 = vsel %vm1980_vm7, %v3919_v17, 0.0 }
 0xd10   : > { %2212 = vadd.xlane.f32.xlu0 %v2211_v23  ;;  %v3856_v23 = vld [vmem:[#allocation24] ss:$8 sps:$4 sm:$0xff]  }
 0xd15   : > { %2217 = vrot.lane.b32.xlu1 %v5412_v18, %s4607_s15 }
 0xd1f   : > { %v1989_v19 = vpop.xlane.xlu0 %1988 }
 0xd20   : > { %3920 = vrcp.f32 %v1989_v19  ;;  %v3858_v19 = vld [vmem:[#allocation24 + $0x4] ss:$8 sps:$4 sm:$0xff]  }
 0xd21   : > { %3922 = vpow2.f32 %v2323_v22  ;;  %v3864_v22 = vld [vmem:[#allocation24 + $0x24] ss:$8 sps:$4 sm:$0xff]  }
 0xd26   : > { %2103 = vrot.lane.b32.xlu0 %v5412_v18, %s4606_s22 }
 0xd2a   : > { %v3921_v24 = vpop.eup %3920 }
 0xd2b   : > { %v1991_v25 = vmul.f32 %v3921_v24, %v3915_v7  ;;  %v3923_v27 = vpop.eup %3922  ;;  %v3862_v24 = vld [vmem:[#allocation24 + $0x20] ss:$8 sps:$4 sm:$0xff]  }
 0xd2c   : > { %v2325_v28 = vsel %vm1980_vm7, %v3923_v27, 0.0 }
 0xd2d   : > { %v1992_v26 = vpack.c.bf16 %v1991_v25, %v1991_v25 }
 0xd2f   : > { %3491 = vmatmul.mubr.msk.bf16.vlgmr.msra.gmra.mrb[32].mxu1 %vm1980_vm7, %v1992_v26 }
 0xd30   : > { %3502 = vmatprep.mubr.msk.bf16.mxu1 %vm4605_vm0, %v4604_v1 }
 0xd39   : > { %2326 = vadd.xlane.f32.xlu1 %v2325_v28 }
 0xd4a   : > { %2331 = vrot.lane.b32.xlu1 %v5412_v18, %s4608_s21 }
 0xd91   : > { %v2098_v31 = vpop.xlane.xlu1 %2097 }
 0xd92   : > { %3924 = vrcp.f32 %v2098_v31  ;;  %v3867_v31 = vld [vmem:[#allocation24 + $0x34] ss:$8 sps:$4 sm:$0xff]  }
 0xd95   : > { %v2218_v38 = vpop.permute.xlu1 %2217 }
 0xd9c   : > { %v3925_v33 = vpop.eup %3924 }
 0xd9d   : > { %v2213_v34 = vpop.xlane.xlu0 %2212  ;;  %v2100_v35 = vmul.f32 %v3925_v33, %v3917_v14  ;;  %v3870_v33 = vld [vmem:[#allocation24 + $0x44] ss:$8 sps:$4 sm:$0xff]  }
 0xd9e   : > { %3926 = vrcp.f32 %v2213_v34  ;;  %v3868_v34 = vld [vmem:[#allocation24 + $0x40] ss:$8 sps:$4 sm:$0xff]  }
 0xd9f   : > { %v2101_v37 = vpack.c.bf16 %v2100_v35, %v2100_v35  ;;  %v3873_v35 = vld [vmem:[#allocation24 + $0x54] ss:$8 sps:$4 sm:$0xff]  }
 0xda1   : > { %v2104_v36 = vpop.permute.xlu0 %2103 }
 0xda2   : > { %3501 = vmatpush3.bf16.msra.mxu1 %v2104_v36  ;;  %v3871_v36 = vld [vmem:[#allocation24 + $0x50] ss:$8 sps:$4 sm:$0xff]  }
 0xda3   : > { %3512 = vmatprep.subr.bf16.mxu1 %v4604_v1 }
 0xda5   : > { %3503 = vmatmul.mubr.msk.bf16.vlgmr.msra.gmra.mrb[36].mxu1 %vm1980_vm7, %v2101_v37  ;;  %v3876_v37 = vld [vmem:[#allocation24 + $0x64] ss:$8 sps:$4 sm:$0xff]  }
 0xda6   : > { %3513 = vmatpush3.bf16.msra.mxu1 %v2218_v38  ;;  %3514 = vmatprep.mubr.msk.bf16.mxu1 %vm4605_vm0, %v4604_v1  ;;  %v3874_v38 = vld [vmem:[#allocation24 + $0x60] ss:$8 sps:$4 sm:$0xff]  }
 0xda7   : > { %3524 = vmatprep.subr.bf16.mxu1 %v4604_v1 }
 0xda8   : > { %v3927_v18 = vpop.eup %3926 }
 0xda9   : > { %v2215_v39 = vmul.f32 %v3927_v18, %v3919_v17  ;;  %v3879_v18 = vld [vmem:[#allocation24 + $0x74] ss:$8 sps:$4 sm:$0xff]  }
 0xdab   : > { %v2216_v40 = vpack.c.bf16 %v2215_v39, %v2215_v39  ;;  %v3877_v39 = vld [vmem:[#allocation24 + $0x70] ss:$8 sps:$4 sm:$0xff]  }
 0xdad   : > { %3515 = vmatmul.mubr.msk.bf16.vlgmr.msra.gmra.mrb[40].mxu1 %vm1980_vm7, %v2216_v40  ;;  %v3880_v40 = vld [vmem:[#allocation27 + $0x40] sm:$0xff]  }
 0xdae   : > { %3526 = vmatprep.mubr.msk.bf16.mxu1 %vm4605_vm0, %v4604_v1 }
 0xdc6   : > { %v2327_v41 = vpop.xlane.xlu1 %2326 }
 0xdc7   : > { %3928 = vrcp.f32 %v2327_v41  ;;  %v3881_v41 = vld [vmem:[#allocation27] sm:$0xff]  }
 0xdca   : > { %v2332_v42 = vpop.permute.xlu1 %2331 }
 0xdcb   : > { %3525 = vmatpush3.bf16.msra.mxu1 %v2332_v42  ;;  %v3882_v42 = vld [vmem:[#allocation27 + $0x48] sm:$0xff]  }
 0xdcc   : > { %2632 = vmatprep.subr.bf16.mxu1 %v3858_v19 }
 0xdd1   : > { %v3929_v43 = vpop.eup %3928 }
 0xdd2   : > { %v2329_v44 = vmul.f32 %v3929_v43, %v3923_v27  ;;  %v3883_v43 = vld [vmem:[#allocation27 + $0x8] sm:$0xff]  }
 0xdd4   : > { %v2330_v45 = vpack.c.bf16 %v2329_v44, %v2329_v44  ;;  %v3884_v44 = vld [vmem:[#allocation27 + $0x50] sm:$0xff]  }
 0xdd6   : > { %3527 = vmatmul.mubr.msk.bf16.vlgmr.msra.gmra.mrb[44].mxu1 %vm1980_vm7, %v2330_v45  ;;  %v3885_v45 = vld [vmem:[#allocation27 + $0x10] sm:$0xff]  }
 0xdd7   : > { %2664 = vmatprep.mubr.bf16.mxu1 %v4603_v0  ;;  %v3851_v0 = vld [vmem:[#allocation18 + $0x18] sm:$0xff]   ;;  %2633 = vmatpush1.bf16.msra.mxu1 %v3856_v23 }
 0xdd8   : > { %3537 = vmatpush3.bf16.msra.mxu0 %v3851_v0  ;;  %2634 = vmatprep.subr.bf16.mxu1 %v3861_v20 }
 0xdd9   : > { %3538 = vmatprep.subr.bf16.mxu0 %v4604_v1 }
 0xddb   : > { %2635 = vmatpush1.bf16.msra.mxu1 %v3859_v21 }
 0xddc   : > { %3539 = vmatpush3.bf16.msra.mxu0 %v3852_v61  ;;  %2636 = vmatprep.subr.bf16.mxu1 %v3864_v22 }
 0xddd   : > { %3540 = vmatprep.subr.bf16.mxu0 %v4604_v1 }
 0xddf   : > { %2637 = vmatpush1.bf16.msra.mxu1 %v3862_v24 }
 0xde0   : > { %3541 = vmatpush3.bf16.msra.mxu0 %v3853_v63  ;;  %2638 = vmatprep.subr.bf16.mxu1 %v3867_v31  ;;  %v3893_v63 = vld [vmem:[#allocation27 + $0x30] sm:$0xff]  }
 0xde1   : > { %3542 = vmatprep.subr.bf16.mxu0 %v4604_v1 }
 0xde4   : > { %3543 = vmatpush3.bf16.msra.mxu0 %v3854_v2  ;;  %v3894_v2 = vld [vmem:[#allocation27 + $0x78] sm:$0xff]  }
 0xde5   : > { %3544 = vmatprep.subr.bf16.mxu0 %v4604_v1  ;;  %v3262_v1 = vld [vmem:[#allocation20] ss:$0 sm:$0xff] }
 0xde8   : > { %3545 = vmatpush3.bf16.msra.mxu0 %v3855_v3  ;;  %v3895_v3 = vld [vmem:[#allocation27 + $0x38] sm:$0xff]  }
 0xde9   : > { %3372 = vmatprep.subr.bf16.mxu0 %v3880_v40 }
 0xe02   : > { %v2030_v46 = vpop.f32.mrb[32].mxu1 }
 0xe03   : > { %2036 = vst.msk [vmem:[#allocation2] sm:$0xff] %vm1173_vm1, %v2030_v46  ;;  %v3492_v47 = vpop.f32.mrb[33].mxu1  ;;  %v3886_v46 = vld [vmem:[#allocation27 + $0x58] sm:$0xff]  }
 0xe04   : > { %v2033_v48 = vpop.f32.mrb[34].mxu1  ;;  %v3887_v47 = vld [vmem:[#allocation27 + $0x18] sm:$0xff]  }
 0xe05   : > { %v3493_v49 = vpop.f32.mrb[35].mxu1  ;;  %v3888_v48 = vld [vmem:[#allocation27 + $0x60] sm:$0xff]  }
 0xe06   : > { %v3889_v49 = vld [vmem:[#allocation27 + $0x20] sm:$0xff]  }
 0xe78   : > { %v2143_v53 = vpop.f32.mrb[36].mxu1 }
 0xe79   : > { %2150 = vrot.lane.b32.xlu0 %v2143_v53, %s4608_s21  ;;  %v3504_v54 = vpop.f32.mrb[37].mxu1 }
 0xe7a   : > { %v2146_v55 = vpop.f32.mrb[38].mxu1 }
 0xe7b   : > { %v3505_v57 = vpop.f32.mrb[39].mxu1 }
 0xe7c   : > { %v3271_v57 = vld [vmem:[#allocation21] ss:$0 sm:$0xff] }
 0xe80   : > { %v2257_v58 = vpop.f32.mrb[40].mxu1 }
 0xe81   : > { %2264 = vrot.lane.b32.xlu1 %v2257_v58, %s4607_s15  ;;  %v3516_v59 = vpop.f32.mrb[41].mxu1  ;;  %v3272_v58 = vld [vmem:[#allocation23] ss:$0 sm:$0xff] }
 0xe82   : > { %v2260_v60 = vpop.f32.mrb[42].mxu1 }
 0xe83   : > { %v3517_v62 = vpop.f32.mrb[43].mxu1 }
 0xe84   : > { %v3892_v62 = vld [vmem:[#allocation27 + $0x70] sm:$0xff]  }
 0xea9   : > { %v2371_v4 = vpop.f32.mrb[44].mxu1 }
 0xeaa   : > { %2378 = vrot.lane.b32.xlu0 %v2371_v4, %s4606_s22  ;;  %v3528_v50 = vpop.f32.mrb[45].mxu1  ;;  %v2540_v4 = vld [vmem:[#allocation26] sm:$0x3]  ;;  %s906_s22 = scalar_lea.vmem [#allocation33], %s3175_s8  ;;  %s4609_s8 = smov [#allocation33]  }
 0xeab   : > { %v2374_v5 = vpop.f32.mrb[46].mxu1  ;;  %v2545_v50 = vrot.slane %v2540_v4, %v5298_v32  ;;  %s2895_s15 = sshll.u32 %s906_s22, 4  ;;  %s4474_s11 = sshll.u32 %s4609_s8, 4  ;;  %s5498_s15 = int_to_ptr.vmem [resolvable:$true] %s2895_s15  ;;  %s4475_s11 = int_to_ptr.vmem [resolvable:$false] %s4474_s11 }
 0xeac   : > { %v3529_v6 = vpop.f32.mrb[47].mxu1  ;;  %v2549_v5 = vrot.slane %v2540_v4, %v5296_v30  ;;  %s4470_s23 = scalar_lea.vmem %s5498_s15, 128  ;;  %s4476_s17 = scalar_lea.vmem %s4475_s11, 256 }
 0xead   : > { %p4471_p13 = scmp.ne.s32.totalorder %s5498_s15, %s4470_s23  ;;  %p4477_p6 = scmp.lt.s32.totalorder %s5498_s15, %s4475_s11 }
 0xeae   : > { %p4478_p10 = scmp.lt.s32.totalorder %s4476_s17, %s4470_s23 }
 0xeaf   : > { %p4472_p7 = pnand %p4471_p13, %p5671_p0 }
 0xeb0   : > { %p4479_p5 = por %p4478_p10, %p4477_p6 }
 0xeb1   : > { %p4473_p2 = pneg %p4472_p7 }
 0xeb3   : > { %p4480_p9 = pnand %p4479_p5, %p4473_p2 }
 0xeeb   : > { %v2151_v7 = vpop.permute.xlu0 %2150 }
 0xeec   : > { %2153 = vst.msk [vmem:[#allocation2] sm:$0xff] %vm1400_vm4, %v2151_v7 }
 0xef3   : > { %v2265_v8 = vpop.permute.xlu1 %2264 }
 0xef4   : > { %2267 = vst.msk [vmem:[#allocation2] sm:$0xff] %vm1517_vm5, %v2265_v8 }
 0xf1c   : > { %v2379_v9 = vpop.permute.xlu0 %2378 }
 0xf1d   : > { %2381 = vst.msk [vmem:[#allocation2] sm:$0xff] %vm1634_vm6, %v2379_v9 }
 0xf24   : > { %v2382_v10 = vld [vmem:[#allocation2] sm:$0xff] }
 0xf25   : > { %v2383_v11 = vpack.c.bf16 %v2382_v10, %v2382_v10 }
 0xf27   : > { %3547 = vmatmul.mubr.bf16.vlgmr.msra.gmra.mrb[32].mxu0 %v2383_v11 }
 0xf28   : > { %3373 = vmatpush3.bf16.msra.mxu0 %v3881_v41 }
 0xf29   : > { %3374 = vmatprep.subr.bf16.mxu0 %v3882_v42 }
 0xf2c   : > { %3375 = vmatpush3.bf16.msra.mxu0 %v3883_v43 }
 0xf2d   : > { %3376 = vmatprep.subr.bf16.mxu0 %v3884_v44 }
 0xf30   : > { %3377 = vmatpush3.bf16.msra.mxu0 %v3885_v45 }
 0xf31   : > { %3378 = vmatprep.subr.bf16.mxu0 %v3886_v46 }
 0xf34   : > { %3379 = vmatpush3.bf16.msra.mxu0 %v3887_v47 }
 0xf35   : > { %3380 = vmatprep.subr.bf16.mxu0 %v3888_v48 }
 0xf38   : > { %3381 = vmatpush3.bf16.msra.mxu0 %v3889_v49 }
 0xf39   : > { %3382 = vmatprep.subr.bf16.mxu0 %v3890_v51 }
 0xf3c   : > { %3383 = vmatpush3.bf16.msra.mxu0 %v3891_v52 }
 0xf3d   : > { %3384 = vmatprep.subr.bf16.mxu0 %v3892_v62 }
 0xf40   : > { %3385 = vmatpush3.bf16.msra.mxu0 %v3893_v63 }
 0xf41   : > { %3386 = vmatprep.subr.bf16.mxu0 %v3894_v2 }
 0xf44   : > { %3387 = vmatpush3.bf16.msra.mxu0 %v3895_v3 }
 0xffa   : > { %v2489_v12 = vpop.f32.mrb[32].mxu0 }
 0xffb   : > { %v2490_v13 = vadd.f32 %v3262_v1, %v2489_v12  ;;  %v3548_v14 = vpop.f32.mrb[33].mxu0 }
 0xffc   : > { %v2492_v15 = vpop.f32.mrb[34].mxu0 }
 0xffd   : > { %v3549_v16 = vpop.f32.mrb[35].mxu0  ;;  %v2495_v17 = vadd.f32 %v2490_v13, %v5419_v29  ;;  %v3865_v29 = vld [vmem:[#allocation24 + $0x30] ss:$8 sps:$4 sm:$0xff]  }
 0xffe   : > { %2639 = vmatpush1.bf16.msra.mxu1 %v3865_v29  ;;  %v3289_v16 = vld [vmem:[#allocation29] ss:$0 sm:$0xff]  ;;  %v3306_v29 = vld [vmem:[#allocation30] ss:$0 sm:$0xff] }
 0xfff   : > { %2496 = vadd.xlane.f32.xlu1 %v2495_v17  ;;  %2640 = vmatprep.subr.bf16.mxu1 %v3870_v33 }
0x1002   : > { %2641 = vmatpush1.bf16.msra.mxu1 %v3868_v34  ;;  %v3307_v34 = vld [vmem:[#allocation32] ss:$0 sm:$0xff] }
0x1003   : > { %2642 = vmatprep.subr.bf16.mxu1 %v3873_v35 }
0x1006   : > { %2643 = vmatpush1.bf16.msra.mxu1 %v3871_v36 }
0x1007   : > { %2644 = vmatprep.subr.bf16.mxu1 %v3876_v37 }
0x100a   : > { %2645 = vmatpush1.bf16.msra.mxu1 %v3874_v38 }
0x100b   : > { %2646 = vmatprep.subr.bf16.mxu1 %v3879_v18 }
0x100e   : > { %2647 = vmatpush1.bf16.msra.mxu1 %v3877_v39 }
0x108c   : > { %v2497_v25 = vpop.xlane.xlu1 %2496 }
0x108d   : > { %v2498_v26 = vmul.f32 0.0078125, %v2497_v25 }
0x108f   : > { %v2499_v27 = vsub.f32 %v2495_v17, %v2498_v26 }
0x1091   : > { %v2500_v28 = vmul.f32 %v2499_v27, %v2499_v27 }
0x1093   : > { %2501 = vadd.xlane.f32.xlu0 %v2500_v28 }
0x1120   : > { %v2502_v53 = vpop.xlane.xlu0 %2501 }
0x1121   : > { %v2503_v54 = vmul.f32 0.0078125, %v2502_v53 }
0x1123   : > { %v2504_v55 = vadd.f32 1e-05, %v2503_v54 }
0x1125   : > { %3930 = vrsqrt.f32 %v2504_v55 }
0x112f   : > { %v3931_v56 = vpop.eup %3930 }
0x1130   : > { %v2506_v0 = vmul.f32 %v3931_v56, %v2499_v27 }
0x1132   : > { %v2514_v59 = vmul.f32 %v3271_v57, %v2506_v0 }
0x1134   : > { %v2522_v60 = vadd.f32 %v3272_v58, %v2514_v59 }
0x1136   : > { %v2523_v61 = vpack.c.bf16 %v2522_v60, %v2522_v60 }
0x1138   : > { %2665 = vmatmul.mubr.bf16.vlgmr.msra.gmra.mrb[48].mxu1 %v2523_v61 }
0x120b   : > { %v2666_v6 = vpop.f32.mrb[48].mxu1 }
0x120c   : > { %v2667_v7 = vadd.f32 %v2666_v6, %v2545_v50  ;;  %v2668_v8 = vpop.f32.mrb[49].mxu1 }
0x120d   : > { %v2669_v9 = vadd.f32 %v2668_v8, %v2549_v5  ;;  %v2670_v10 = vpop.f32.mrb[50].mxu1 }
0x120e   : > { %v2673_v11 = vmax.f32 %v2667_v7, 0.0  ;;  %v2671_v1 = vpop.f32.mrb[51].mxu1 }
0x120f   : > { %v2674_v12 = vmax.f32 %v2669_v9, 0.0 }
0x1210   : > { %v2675_v14 = vpack.c.bf16 %v2673_v11, %v2673_v11 }
0x1211   : > { %v2676_v13 = vpack.c.bf16 %v2674_v12, %v2674_v12 }
0x1213   : > { %2844 = vmatprep.mubr.bf16.mxu0 %v2676_v13 }
0x1214   : > { %2845 = vmatmul.mubr.bf16.vlgmr.msra.gmra.mrb[36].mxu0 %v2675_v14 }
0x12e7   : > { %v3388_v15 = vpop.f32.mrb[36].mxu0 }
0x12e8   : > { %v3389_v17 = vpop.f32.mrb[37].mxu0 }
0x12e9   : > { %v3390_v23 = vadd.f32 %v3389_v17, %v3388_v15  ;;  %v3391_v19 = vpop.f32.mrb[38].mxu0 }
0x12ea   : > { %v3392_v32 = vpop.f32.mrb[39].mxu0 }
0x12eb   : > { %v2847_v20 = vadd.f32 %v3390_v23, %v3289_v16 }
0x12ed   : > { %v2852_v30 = vadd.f32 %v2847_v20, %v2522_v60 }
0x12ef   : > { %2853 = vadd.xlane.f32.xlu0 %v2852_v30 }
0x137c   : > { %v2854_v21 = vpop.xlane.xlu0 %2853 }
0x137d   : > { %v2855_v22 = vmul.f32 0.0078125, %v2854_v21 }
0x137f   : > { %v2856_v24 = vsub.f32 %v2852_v30, %v2855_v22 }
0x1381   : > { %v2857_v25 = vmul.f32 %v2856_v24, %v2856_v24 }
0x1383   : > { %2858 = vadd.xlane.f32.xlu1 %v2857_v25 }
0x1410   : > { %v2859_v26 = vpop.xlane.xlu1 %2858 }
0x1411   : > { %v2860_v27 = vmul.f32 0.0078125, %v2859_v26 }
0x1413   : > { %v2861_v28 = vadd.f32 1e-05, %v2860_v27 }
0x1415   : > { %3932 = vrsqrt.f32 %v2861_v28 }
0x141f   : > { %v3933_v31 = vpop.eup %3932 }
0x1420   : > { %v2863_v33 = vmul.f32 %v3933_v31, %v2856_v24 }
0x1422   : > { %v2871_v35 = vmul.f32 %v3306_v29, %v2863_v33 }
0x1424   : > { %v2879_v36 = vadd.f32 %v3307_v34, %v2871_v35 }
0x1426   : > { %2880 = vst [vmem:[%s906_s22] sm:$0xff] %v2879_v36 }
0x1427   : > { %4483 = shalt.err (!%p4480_p9)
}
0x1428   : > { %s4484_s4 = scalar_lea.hbm %s5496_s6, 128  ;;  %s4488_s30 = scalar_lea.hbm %s5670_s0, 256 }
0x1429   : > { %p4485_p4 = scmp.ne.s32.totalorder %s5496_s6, %s4484_s4  ;;  %p4489_p3 = scmp.lt.u32.totalorder %s5496_s6, %s5670_s0 }
0x142a   : > { %p4490_p12 = scmp.lt.u32.totalorder %s4488_s30, %s4484_s4  ;;  %p4492_p13 = scmp.lt.u32.totalorder %s4484_s4, %s5496_s6 }
0x142b   : > { %p4486_p8 = pnand %p4485_p4, %p5671_p0 }
0x142c   : > { %p4491_p1 = por %p4490_p12, %p4489_p3 }
0x142d   : > { %p4487_p11 = pneg %p4486_p8 }
0x142e   : > { %p4493_p7 = por %p4492_p13, %p4491_p1 }
0x1430   : > { %p4494_p2 = pnand %p4493_p7, %p4487_p11 }
0x1432   : > { %4497 = shalt.err (!%p4494_p2)
}
0x1433   : > { %3622 = dma.vmem_to_hbm [thread:$0]  (%p5671_p0), %s5498_s15, 128, %s5496_s6, %s2882_s12  }
0x1434 PF: > { %s5672_s1 = sld [smem:[#allocation46_spill]]  ;;  %s5673_s22 = sld [smem:[#allocation49_spill]] }
0x1435   : > { %p5674_p6 = scmp.ne.s32.totalorder %s5642_s5, 0 }
0x143a   : > { %s2907_s21 = sand.u32 1, %s5672_s1   ;;  %p5675_p10 = scmp.ge.s32.totalorder %s5673_s22, 2 }
0x143b   : > { %s2908_s7 = scalar_lea.sflag [#allocation5], %s2907_s21 }
0x143c   : > { %p3684_p5 = pnand %p5675_p10, %p5674_p6 }
0x143e   : > { %4559 = dma.done.wait (!%p3684_p5), %s2908_s7, 128  }
0x143f   : > { %4561 = vsyncadd (!%p3684_p5), %s2908_s7, 4294967168  ;;  %s5676_s1 = sld [smem:[#allocation47_spill]]  ;;  %s5677_s22 = sld [smem:[#allocation48_spill]] }
0x1440   : > { %p44_p9 = scmp.ge.s32.totalorder %s5103_s24, 4   ;;  %s5678_s23 = smov %s5115_s25 }
0x1442   :  { %46 = sbr.rel (!%p44_p9) target bundleno = 34 (0x22), region = 226 }
0x1449   :  { %2913 = vsyncpa [#allocation4], 1 }
0x144a   :  { %2915 = vsyncpa [#allocation4 + $0x1], 1 }
0x144b   :  { %2916 = vsyncpa [#allocation7], 1 }
0x144c   :  { %2918 = vsyncpa [#allocation7 + $0x1], 1 }
0x144d   :  { %2919 = vsyncpa [#allocation10], 1 }
0x144e   :  { %2920 = vsyncpa [#allocation13], 1 }
0x144f   :  { %2921 = vsyncpa [#allocation16], 1 }
0x1450   :  { %2922 = vsyncpa [#allocation19], 1 }
0x1451   :  { %2923 = vsyncpa [#allocation22], 1 }
0x1452   :  { %2924 = vsyncpa [#allocation25], 1 }
0x1453   :  { %2925 = vsyncpa [#allocation28], 1 }
0x1454   :  { %2926 = vsyncpa [#allocation31], 1 }
0x1455   :  { %2927 = vsyncpa [#allocation5], 1 }
0x1456   :  { %2929 = vsyncpa [#allocation5 + $0x1], 1 }

</bundles_post_ra>
